<compile_context>
chip_gen: v5e
topology: v5e:2x2
jax: 0.10.0
libtpu: 0.0.40
codegen_flags: <defaults>
</compile_context>

<pallas_src>
import functools

import jax
import jax.numpy as jnp
from jax import lax
from jax.experimental import pallas as pl
from jax.experimental.pallas import tpu as pltpu

_SLOPE = 0.2     # LeakyReLU negative slope used throughout the module
_OFF = 128       # lane offset of the tile's first in-sequence column in the scratch


def _leaky(x):
    return jnp.where(x >= 0, x, _SLOPE * x)


# ----------------------------------------------------------------------------
# Fused ResBlock kernel: input_act -> 3x (LeakyReLU -> dilated conv -> conv ->
# +residual), all in one grid step, intermediates never touch HBM.
# ----------------------------------------------------------------------------
def _resblock_kernel(x_ref, ln_ref, rn_ref, w1_ref, b1_ref, w2_ref, b2_ref,
                     o_ref, xw_ref, hw_ref, *, ksize, dilations, tile_len,
                     compute_dtype):
    K = ksize
    P = K // 2
    TL = tile_len
    C = x_ref.shape[1]
    n_blk = len(dilations)
    halos = [P * d + P for d in dilations]          # per-sub-block halo
    # R[i] = halo of sub-block i's *input* window (suffix sum of halos)
    R = [0] * (n_blk + 1)
    for i in range(n_blk - 1, -1, -1):
        R[i] = R[i + 1] + halos[i]
    H = R[0]

    t = pl.program_id(1)
    n_t = pl.num_programs(1)
    is_left = t == 0
    is_right = t == n_t - 1
    last_main = _OFF + TL - 1                        # column of last in-seq element

    # ------------------------------------------------------------------
    # Assemble x0 = input_act(x) window (running residual) into xw_ref.
    # Column (_OFF + q) holds sequence-relative position q.
    # ------------------------------------------------------------------
    xw_ref[:, _OFF:_OFF + TL] = _leaky(x_ref[0].astype(jnp.float32))

    if H > 0:
        @pl.when(t > 0)                              # interior: real neighbour data
        def _():
            xw_ref[:, _OFF - H:_OFF] = _leaky(
                ln_ref[0][:, 128 - H:].astype(jnp.float32))

        @pl.when(t < n_t - 1)
        def _():
            xw_ref[:, _OFF + TL:_OFF + TL + H] = _leaky(
                rn_ref[0][:, :H].astype(jnp.float32))

        @pl.when(is_left)                            # sequence edge: x[-j] = x[j]
        def _():
            for j in range(1, H + 1):
                xw_ref[:, _OFF - j:_OFF - j + 1] = xw_ref[:, _OFF + j:_OFF + j + 1]

        @pl.when(is_right)
        def _():
            for j in range(1, H + 1):
                xw_ref[:, last_main + j:last_main + j + 1] = \
                    xw_ref[:, last_main - j:last_main - j + 1]

    # ------------------------------------------------------------------
    # The dilation sub-blocks, fully fused.
    # ------------------------------------------------------------------
    for i, d in enumerate(dilations):
        Ri, Rn = R[i], R[i + 1]
        pad1 = P * d                 # conv1 reflect pad
        Wa = TL + 2 * Ri             # conv1 input window width
        Wh = TL + 2 * (Rn + P)       # conv1 output / conv2 input window width
        Wy = TL + 2 * Rn             # conv2 output / residual update width

        # conv1 edge fix: the reference reflect-pads leaky(x_i) by pad1 at the
        # sequence ends.  (i == 0 is covered by the initial reflect fill above.)
        if i > 0 and pad1 > 0:
            @pl.when(is_left)
            def _():
                for j in range(1, pad1 + 1):
                    xw_ref[:, _OFF - j:_OFF - j + 1] = \
                        xw_ref[:, _OFF + j:_OFF + j + 1]

            @pl.when(is_right)
            def _():
                for j in range(1, pad1 + 1):
                    xw_ref[:, last_main + j:last_main + j + 1] = \
                        xw_ref[:, last_main - j:last_main - j + 1]

        # ---- conv1 (dilated): K accumulated MXU matmuls, f32 accumulation ----
        # Cast once, BEFORE building the K lane-shifted operand slices.
        a = _leaky(xw_ref[:, _OFF - Ri:_OFF - Ri + Wa]).astype(compute_dtype)
        h = jnp.dot(w1_ref[i * K + 0], a[:, 0:Wh],
                    preferred_element_type=jnp.float32)
        for k in range(1, K):
            h = h + jnp.dot(w1_ref[i * K + k], a[:, k * d:k * d + Wh],
                            preferred_element_type=jnp.float32)
        h = h + b1_ref[i]

        # Stage h in VMEM (matmul dtype) so conv2's reflect pad at the sequence
        # edges is two tiny gated column copies; column (Rn + P) holds position 0.
        hw_ref[:, :Wh] = h.astype(compute_dtype)
        c0 = Rn + P                   # column of h position 0
        ce = Rn + P + TL - 1          # column of h position TL-1

        if P > 0:
            @pl.when(is_left)
            def _():
                for j in range(1, P + 1):
                    hw_ref[:, c0 - j:c0 - j + 1] = hw_ref[:, c0 + j:c0 + j + 1]

            @pl.when(is_right)
            def _():
                for j in range(1, P + 1):
                    hw_ref[:, ce + j:ce + j + 1] = hw_ref[:, ce - j:ce - j + 1]

        # ---- conv2 (dilation 1) + bias ----
        y = jnp.dot(w2_ref[i * K + 0], hw_ref[:, 0:Wy],
                    preferred_element_type=jnp.float32)
        for k in range(1, K):
            y = y + jnp.dot(w2_ref[i * K + k], hw_ref[:, k:k + Wy],
                            preferred_element_type=jnp.float32)
        y = y + b2_ref[i]

        # ---- residual add ----
        if i == n_blk - 1:
            o_ref[0] = (xw_ref[:, _OFF:_OFF + TL] + y).astype(o_ref.dtype)
        else:
            cur = xw_ref[:, _OFF - Rn:_OFF - Rn + Wy]
            xw_ref[:, _OFF - Rn:_OFF - Rn + Wy] = cur + y


# ----------------------------------------------------------------------------
# Tile-size / VMEM heuristics (generation-aware)
# ----------------------------------------------------------------------------
def _default_max_tile(channels):
    try:
        vmem = pltpu.get_tpu_info().vmem_capacity_bytes
    except Exception:
        vmem = 128 * 1024 * 1024
    small_vmem = vmem <= 64 * 1024 * 1024            # v7x-style budget
    if channels >= 256:
        return 512 if small_vmem else 1024
    return 1024 if small_vmem else 2048


def _auto_tile_len(L, channels, max_tile=None):
    assert L % 128 == 0, "sequence length must be a multiple of 128 lanes"
    if max_tile is None:
        max_tile = _default_max_tile(channels)
    tl = (min(L, max_tile) // 128) * 128
    while L % tl != 0:                               # largest *128 divisor of L
        tl -= 128
    return tl


def _vmem_limit_bytes(C, TL, K, n_blk, H, compute_dtype):
    cb = jnp.dtype(compute_dtype).itemsize
    tile = C * TL * 4
    weights = 2 * n_blk * K * C * C * cb + 2 * n_blk * C * 4
    est = (4 * tile                                  # x + out tiles, double-buffered
           + 4 * C * 128 * 4                         # halo blocks, double-buffered
           + C * (TL + 2 * _OFF) * 4                 # residual window scratch
           + C * (TL + 2 * H) * cb                   # conv1-output staging scratch
           + 2 * weights                             # weights/bias, double-buffered
           + 8 * tile)                               # headroom for value intermediates
    est = int(est * 1.25)
    return max(min(est, 100 * 1024 * 1024), 16 * 1024 * 1024)


# ----------------------------------------------------------------------------
# One-time parameter preparation (hoisted out of the per-call wrapper)
# ----------------------------------------------------------------------------
def prepare_resblock_params(raw_params, compute_dtype=jnp.bfloat16):
    """raw_params: list of (w1, b1, w2, b2); weights in PyTorch (Cout, Cin, K) layout.

    Returns kernel-ready arrays:
      w1, w2: (n_blocks*K, Cout, Cin) in the MXU operand dtype (one slice per tap)
      b1, b2: (n_blocks, Cout, 1) float32
    """
    w1 = jnp.concatenate([jnp.transpose(p[0], (2, 0, 1)) for p in raw_params],
                         axis=0).astype(compute_dtype)
    w2 = jnp.concatenate([jnp.transpose(p[2], (2, 0, 1)) for p in raw_params],
                         axis=0).astype(compute_dtype)
    b1 = jnp.stack([p[1].reshape(-1, 1) for p in raw_params]).astype(jnp.float32)
    b2 = jnp.stack([p[3].reshape(-1, 1) for p in raw_params]).astype(jnp.float32)
    return w1, b1, w2, b2


# ----------------------------------------------------------------------------
# ResBlock forward: one fused pallas_call for the whole residual module
# ----------------------------------------------------------------------------
def resblock_forward(x, prepared, *, kernel_size, dilation_rates, tile_len=None,
                     compute_dtype=jnp.bfloat16):
    w1, b1, w2, b2 = prepared
    B, C, L = x.shape
    K = kernel_size
    P = K // 2
    n_blk = len(dilation_rates)
    H = sum(P * d + P for d in dilation_rates)       # combined halo of the module

    if tile_len is None:
        tile_len = _auto_tile_len(L, C)
    TL = tile_len
    assert L % 128 == 0, "sequence length must be a multiple of 128 lanes"
    assert TL % 128 == 0 and L % TL == 0, "tile_len must divide L and be a *128"
    assert H + 1 <= TL and H <= _OFF, "combined halo must fit one 128-lane block"
    T = L // TL
    blk = TL // 128
    nlb = L // 128

    kernel = functools.partial(
        _resblock_kernel, ksize=K, dilations=tuple(dilation_rates), tile_len=TL,
        compute_dtype=compute_dtype)

    in_specs = [
        pl.BlockSpec((1, C, TL), lambda b, t: (b, 0, t)),                  # main tile
        pl.BlockSpec((1, C, 128),                                          # left halo
                     lambda b, t: (b, 0, jnp.maximum(t * blk - 1, 0))),
        pl.BlockSpec((1, C, 128),                                          # right halo
                     lambda b, t: (b, 0, jnp.minimum(t * blk + blk, nlb - 1))),
        # weights/biases: constant across the grid (candidates for pl.Buffered(1)
        # on VMEM-tight chips; left at the default buffering for portability).
        pl.BlockSpec(w1.shape, lambda b, t: (0, 0, 0)),
        pl.BlockSpec(b1.shape, lambda b, t: (0, 0, 0)),
        pl.BlockSpec(w2.shape, lambda b, t: (0, 0, 0)),
        pl.BlockSpec(b2.shape, lambda b, t: (0, 0, 0)),
    ]

    scratch_shapes = [
        pltpu.VMEM((C, TL + 2 * _OFF), jnp.float32),       # running residual window
        pltpu.VMEM((C, TL + 2 * H), compute_dtype),        # conv1-output staging
    ]

    return pl.pallas_call(
        kernel,
        out_shape=jax.ShapeDtypeStruct((B, C, L), x.dtype),
        grid=(B, T),
        in_specs=in_specs,
        out_specs=pl.BlockSpec((1, C, TL), lambda b, t: (b, 0, t)),
        scratch_shapes=scratch_shapes,
        compiler_params=pltpu.CompilerParams(
            dimension_semantics=("parallel", "parallel"),
            vmem_limit_bytes=_vmem_limit_bytes(C, TL, K, n_blk, H, compute_dtype)),
    )(x, x, x, w1, b1, w2, b2)


# ----------------------------------------------------------------------------
# Pure-JAX reference (exact PyTorch ResBlock semantics, reflect pad per conv)
# ----------------------------------------------------------------------------
def resblock_ref(x, raw_params, *, kernel_size, dilation_rates):
    def conv1d(inp, w, b, dilation, pad):
        xp = jnp.pad(inp, ((0, 0), (0, 0), (pad, pad)), mode="reflect")
        y = lax.conv_general_dilated(
            xp, w, window_strides=(1,), padding="VALID",
            rhs_dilation=(dilation,), dimension_numbers=("NCH", "OIH", "NCH"),
            precision=lax.Precision.HIGHEST)
        return y + b[None, :, None]

    x = _leaky(x)
    for (w1, b1, w2, b2), d in zip(raw_params, dilation_rates):
        h = conv1d(_leaky(x), w1, b1, d, kernel_size // 2 * d)
        h = conv1d(h, w2, b2, 1, kernel_size // 2)
        x = x + h
    return x


# ----------------------------------------------------------------------------
# Deterministic parameter init (PyTorch Conv1d default uniform init)
# ----------------------------------------------------------------------------
def init_resblock_params(key, channels, kernel_size, dilation_rates):
    params = []
    s = 1.0 / (channels * kernel_size) ** 0.5
    for _ in dilation_rates:
        key, k1, k2, k3, k4 = jax.random.split(key, 5)
        w1 = jax.random.uniform(k1, (channels, channels, kernel_size),
                                jnp.float32, -s, s)
        b1 = jax.random.uniform(k2, (channels,), jnp.float32, -s, s)
        w2 = jax.random.uniform(k3, (channels, channels, kernel_size),
                                jnp.float32, -s, s)
        b2 = jax.random.uniform(k4, (channels,), jnp.float32, -s, s)
        params.append((w1, b1, w2, b2))
    return params


if __name__ == "__main__":
    K = 3
    dilations = [1, 3, 5]
    key = jax.random.PRNGKey(0)

    # ---- Config A: single length tile (both sequence edges), f32 matmul operands ----
    B, C, L = 2, 8, 512
    key, kx, kp = jax.random.split(key, 3)
    x = jax.random.normal(kx, (B, C, L), jnp.float32)
    raw = init_resblock_params(kp, C, K, dilations)
    prep_f32 = prepare_resblock_params(raw, compute_dtype=jnp.float32)
    out = resblock_forward(x, prep_f32, kernel_size=K, dilation_rates=dilations,
                           compute_dtype=jnp.float32)
    out = jax.block_until_ready(out)
    ref = resblock_ref(x, raw, kernel_size=K, dilation_rates=dilations)
    err = float(jnp.max(jnp.abs(out - ref)))
    assert out.shape == (B, C, L)
    assert jnp.allclose(out, ref, rtol=2e-2, atol=2e-2), \
        f"f32 mismatch, max err {err}"

    # ---- Config B: 3 length tiles (left edge / interior / right edge), bf16 matmuls ----
    B2, C2, L2 = 1, 16, 1536
    key, kx2, kp2 = jax.random.split(key, 3)
    x2 = jax.random.normal(kx2, (B2, C2, L2), jnp.float32)
    raw2 = init_resblock_params(kp2, C2, K, dilations)
    prep_bf16 = prepare_resblock_params(raw2, compute_dtype=jnp.bfloat16)
    out2 = resblock_forward(x2, prep_bf16, kernel_size=K, dilation_rates=dilations,
                            tile_len=512, compute_dtype=jnp.bfloat16)
    out2 = jax.block_until_ready(out2)
    ref2 = resblock_ref(x2, raw2, kernel_size=K, dilation_rates=dilations)
    err2 = float(jnp.max(jnp.abs(out2 - ref2)))
    assert out2.shape == (B2, C2, L2)
    assert jnp.allclose(out2, ref2, rtol=5e-2, atol=5e-2), \
        f"bf16 mismatch, max err {err2}"

    print("KERNEL_OK")
</pallas_src>

<mosaic_0001>
module attributes {stable_mosaic.version = 11 : i64} {
  func.func @_resblock_kernel(%arg0: i32, %arg1: i32, %arg2: memref<1x8x512xf32, #tpu.memory_space<vmem>>, %arg3: memref<1x8x128xf32, #tpu.memory_space<vmem>>, %arg4: memref<1x8x128xf32, #tpu.memory_space<vmem>>, %arg5: memref<9x8x8xf32, #tpu.memory_space<vmem>>, %arg6: memref<3x8x1xf32, #tpu.memory_space<vmem>>, %arg7: memref<9x8x8xf32, #tpu.memory_space<vmem>>, %arg8: memref<3x8x1xf32, #tpu.memory_space<vmem>>, %arg9: memref<1x8x512xf32, #tpu.memory_space<vmem>>, %arg10: memref<8x768xf32, #tpu.memory_space<vmem>>, %arg11: memref<8x536xf32, #tpu.memory_space<vmem>>) attributes {dimension_semantics = [#tpu.dimension_semantics<parallel>, #tpu.dimension_semantics<parallel>], iteration_bounds = array<i64: 2, 1>, scalar_prefetch = 0 : i64, scratch_operands = 2 : i64, tpu.core_type = #tpu.core_type<tc>, window_params = [{transform_indices = @transform_0, window_bounds = array<i64: 1, 8, 512>}, {transform_indices = @transform_1, window_bounds = array<i64: 1, 8, 128>}, {transform_indices = @transform_2, window_bounds = array<i64: 1, 8, 128>}, {pipeline_mode = #tpu.pipeline_mode<synchronous>, transform_indices = @transform_3, window_bounds = array<i64: 9, 8, 8>}, {pipeline_mode = #tpu.pipeline_mode<synchronous>, transform_indices = @transform_4, window_bounds = array<i64: 3, 8, 1>}, {pipeline_mode = #tpu.pipeline_mode<synchronous>, transform_indices = @transform_5, window_bounds = array<i64: 9, 8, 8>}, {pipeline_mode = #tpu.pipeline_mode<synchronous>, transform_indices = @transform_6, window_bounds = array<i64: 3, 8, 1>}, {transform_indices = @transform_7, window_bounds = array<i64: 1, 8, 512>}]} {
    %c0_i32 = arith.constant 0 : i32
    %0 = arith.cmpi eq, %arg1, %c0_i32 : i32
    %c0_i32_0 = arith.constant 0 : i32
    %1 = arith.cmpi eq, %arg1, %c0_i32_0 : i32
    %c0 = arith.constant 0 : index
    %c0_1 = arith.constant 0 : index
    %c0_2 = arith.constant 0 : index
    %2 = vector.load %arg2[%c0, %c0_1, %c0_2] : memref<1x8x512xf32, #tpu.memory_space<vmem>>, vector<1x8x512xf32>
    %3 = vector.shape_cast %2 : vector<1x8x512xf32> to vector<8x512xf32>
    %cst = arith.constant 0.000000e+00 : f32
    %4 = vector.broadcast %cst : f32 to vector<8x512xf32>
    %5 = arith.cmpf oge, %3, %4 : vector<8x512xf32>
    %cst_3 = arith.constant 2.000000e-01 : f32
    %6 = vector.broadcast %cst_3 : f32 to vector<8x512xf32>
    %7 = arith.mulf %6, %3 : vector<8x512xf32>
    %8 = arith.select %5, %3, %7 : vector<8x512xi1>, vector<8x512xf32>
    %c0_4 = arith.constant 0 : index
    %c128 = arith.constant 128 : index
    %9 = vector.load %arg10[%c0_4, %c128] : memref<8x768xf32, #tpu.memory_space<vmem>>, vector<8x512xf32>
    tpu.vector_store %arg10[%c0_4, %c128], %8 {strides = array<i32>} : memref<8x768xf32, #tpu.memory_space<vmem>>, vector<8x512xf32>,
    %c0_i32_5 = arith.constant 0 : i32
    %10 = arith.cmpi sgt, %arg1, %c0_i32_5 : i32
    %11 = arith.extui %10 : i1 to i32
    %c0_i32_6 = arith.constant 0 : i32
    %12 = arith.cmpi ne, %11, %c0_i32_6 : i32
    scf.if %12 {
      %c0_149 = arith.constant 0 : index
      %c0_150 = arith.constant 0 : index
      %c0_151 = arith.constant 0 : index
      %180 = vector.load %arg3[%c0_149, %c0_150, %c0_151] : memref<1x8x128xf32, #tpu.memory_space<vmem>>, vector<1x8x128xf32>
      %181 = vector.shape_cast %180 : vector<1x8x128xf32> to vector<8x128xf32>
      %182 = vector.extract_strided_slice %181 {offsets = [0, 116], sizes = [8, 12], strides = [1, 1]} : vector<8x128xf32> to vector<8x12xf32>
      %cst_152 = arith.constant 0.000000e+00 : f32
      %183 = vector.broadcast %cst_152 : f32 to vector<8x12xf32>
      %184 = arith.cmpf oge, %182, %183 : vector<8x12xf32>
      %cst_153 = arith.constant 2.000000e-01 : f32
      %185 = vector.broadcast %cst_153 : f32 to vector<8x12xf32>
      %186 = arith.mulf %185, %182 : vector<8x12xf32>
      %187 = arith.select %184, %182, %186 : vector<8x12xi1>, vector<8x12xf32>
      %c0_154 = arith.constant 0 : index
      %c116_155 = arith.constant 116 : index
      %188 = vector.load %arg10[%c0_154, %c116_155] : memref<8x768xf32, #tpu.memory_space<vmem>>, vector<8x12xf32>
      tpu.vector_store %arg10[%c0_154, %c116_155], %187 {strides = array<i32>} : memref<8x768xf32, #tpu.memory_space<vmem>>, vector<8x12xf32>,
    } else {
    }
    %c0_i32_7 = arith.constant 0 : i32
    %13 = arith.cmpi slt, %arg1, %c0_i32_7 : i32
    %14 = arith.extui %13 : i1 to i32
    %c0_i32_8 = arith.constant 0 : i32
    %15 = arith.cmpi ne, %14, %c0_i32_8 : i32
    scf.if %15 {
      %c0_149 = arith.constant 0 : index
      %c0_150 = arith.constant 0 : index
      %c0_151 = arith.constant 0 : index
      %180 = vector.load %arg4[%c0_149, %c0_150, %c0_151] : memref<1x8x128xf32, #tpu.memory_space<vmem>>, vector<1x8x128xf32>
      %181 = vector.shape_cast %180 : vector<1x8x128xf32> to vector<8x128xf32>
      %182 = vector.extract_strided_slice %181 {offsets = [0, 0], sizes = [8, 12], strides = [1, 1]} : vector<8x128xf32> to vector<8x12xf32>
      %cst_152 = arith.constant 0.000000e+00 : f32
      %183 = vector.broadcast %cst_152 : f32 to vector<8x12xf32>
      %184 = arith.cmpf oge, %182, %183 : vector<8x12xf32>
      %cst_153 = arith.constant 2.000000e-01 : f32
      %185 = vector.broadcast %cst_153 : f32 to vector<8x12xf32>
      %186 = arith.mulf %185, %182 : vector<8x12xf32>
      %187 = arith.select %184, %182, %186 : vector<8x12xi1>, vector<8x12xf32>
      %c0_154 = arith.constant 0 : index
      %c640 = arith.constant 640 : index
      %188 = vector.load %arg10[%c0_154, %c640] : memref<8x768xf32, #tpu.memory_space<vmem>>, vector<8x12xf32>
      tpu.vector_store %arg10[%c0_154, %c640], %187 {strides = array<i32>} : memref<8x768xf32, #tpu.memory_space<vmem>>, vector<8x12xf32>,
    } else {
    }
    %16 = arith.extui %0 : i1 to i32
    %c0_i32_9 = arith.constant 0 : i32
    %17 = arith.cmpi ne, %16, %c0_i32_9 : i32
    scf.if %17 {
      %c0_149 = arith.constant 0 : index
      %c129 = arith.constant 129 : index
      %180 = vector.load %arg10[%c0_149, %c129] : memref<8x768xf32, #tpu.memory_space<vmem>>, vector<8x1xf32>
      %c0_150 = arith.constant 0 : index
      %c127 = arith.constant 127 : index
      %181 = vector.load %arg10[%c0_150, %c127] : memref<8x768xf32, #tpu.memory_space<vmem>>, vector<8x1xf32>
      tpu.vector_store %arg10[%c0_150, %c127], %180 {strides = array<i32>} : memref<8x768xf32, #tpu.memory_space<vmem>>, vector<8x1xf32>,
      %c0_151 = arith.constant 0 : index
      %c130 = arith.constant 130 : index
      %182 = vector.load %arg10[%c0_151, %c130] : memref<8x768xf32, #tpu.memory_space<vmem>>, vector<8x1xf32>
      %c0_152 = arith.constant 0 : index
      %c126 = arith.constant 126 : index
      %183 = vector.load %arg10[%c0_152, %c126] : memref<8x768xf32, #tpu.memory_space<vmem>>, vector<8x1xf32>
      tpu.vector_store %arg10[%c0_152, %c126], %182 {strides = array<i32>} : memref<8x768xf32, #tpu.memory_space<vmem>>, vector<8x1xf32>,
      %c0_153 = arith.constant 0 : index
      %c131 = arith.constant 131 : index
      %184 = vector.load %arg10[%c0_153, %c131] : memref<8x768xf32, #tpu.memory_space<vmem>>, vector<8x1xf32>
      %c0_154 = arith.constant 0 : index
      %c125 = arith.constant 125 : index
      %185 = vector.load %arg10[%c0_154, %c125] : memref<8x768xf32, #tpu.memory_space<vmem>>, vector<8x1xf32>
      tpu.vector_store %arg10[%c0_154, %c125], %184 {strides = array<i32>} : memref<8x768xf32, #tpu.memory_space<vmem>>, vector<8x1xf32>,
      %c0_155 = arith.constant 0 : index
      %c132 = arith.constant 132 : index
      %186 = vector.load %arg10[%c0_155, %c132] : memref<8x768xf32, #tpu.memory_space<vmem>>, vector<8x1xf32>
      %c0_156 = arith.constant 0 : index
      %c124 = arith.constant 124 : index
      %187 = vector.load %arg10[%c0_156, %c124] : memref<8x768xf32, #tpu.memory_space<vmem>>, vector<8x1xf32>
      tpu.vector_store %arg10[%c0_156, %c124], %186 {strides = array<i32>} : memref<8x768xf32, #tpu.memory_space<vmem>>, vector<8x1xf32>,
      %c0_157 = arith.constant 0 : index
      %c133 = arith.constant 133 : index
      %188 = vector.load %arg10[%c0_157, %c133] : memref<8x768xf32, #tpu.memory_space<vmem>>, vector<8x1xf32>
      %c0_158 = arith.constant 0 : index
      %c123 = arith.constant 123 : index
      %189 = vector.load %arg10[%c0_158, %c123] : memref<8x768xf32, #tpu.memory_space<vmem>>, vector<8x1xf32>
      tpu.vector_store %arg10[%c0_158, %c123], %188 {strides = array<i32>} : memref<8x768xf32, #tpu.memory_space<vmem>>, vector<8x1xf32>,
      %c0_159 = arith.constant 0 : index
      %c134 = arith.constant 134 : index
      %190 = vector.load %arg10[%c0_159, %c134] : memref<8x768xf32, #tpu.memory_space<vmem>>, vector<8x1xf32>
      %c0_160 = arith.constant 0 : index
      %c122_161 = arith.constant 122 : index
      %191 = vector.load %arg10[%c0_160, %c122_161] : memref<8x768xf32, #tpu.memory_space<vmem>>, vector<8x1xf32>
      tpu.vector_store %arg10[%c0_160, %c122_161], %190 {strides = array<i32>} : memref<8x768xf32, #tpu.memory_space<vmem>>, vector<8x1xf32>,
      %c0_162 = arith.constant 0 : index
      %c135 = arith.constant 135 : index
      %192 = vector.load %arg10[%c0_162, %c135] : memref<8x768xf32, #tpu.memory_space<vmem>>, vector<8x1xf32>
      %c0_163 = arith.constant 0 : index
      %c121 = arith.constant 121 : index
      %193 = vector.load %arg10[%c0_163, %c121] : memref<8x768xf32, #tpu.memory_space<vmem>>, vector<8x1xf32>
      tpu.vector_store %arg10[%c0_163, %c121], %192 {strides = array<i32>} : memref<8x768xf32, #tpu.memory_space<vmem>>, vector<8x1xf32>,
      %c0_164 = arith.constant 0 : index
      %c136 = arith.constant 136 : index
      %194 = vector.load %arg10[%c0_164, %c136] : memref<8x768xf32, #tpu.memory_space<vmem>>, vector<8x1xf32>
      %c0_165 = arith.constant 0 : index
      %c120 = arith.constant 120 : index
      %195 = vector.load %arg10[%c0_165, %c120] : memref<8x768xf32, #tpu.memory_space<vmem>>, vector<8x1xf32>
      tpu.vector_store %arg10[%c0_165, %c120], %194 {strides = array<i32>} : memref<8x768xf32, #tpu.memory_space<vmem>>, vector<8x1xf32>,
      %c0_166 = arith.constant 0 : index
      %c137 = arith.constant 137 : index
      %196 = vector.load %arg10[%c0_166, %c137] : memref<8x768xf32, #tpu.memory_space<vmem>>, vector<8x1xf32>
      %c0_167 = arith.constant 0 : index
      %c119 = arith.constant 119 : index
      %197 = vector.load %arg10[%c0_167, %c119] : memref<8x768xf32, #tpu.memory_space<vmem>>, vector<8x1xf32>
      tpu.vector_store %arg10[%c0_167, %c119], %196 {strides = array<i32>} : memref<8x768xf32, #tpu.memory_space<vmem>>, vector<8x1xf32>,
      %c0_168 = arith.constant 0 : index
      %c138 = arith.constant 138 : index
      %198 = vector.load %arg10[%c0_168, %c138] : memref<8x768xf32, #tpu.memory_space<vmem>>, vector<8x1xf32>
      %c0_169 = arith.constant 0 : index
      %c118_170 = arith.constant 118 : index
      %199 = vector.load %arg10[%c0_169, %c118_170] : memref<8x768xf32, #tpu.memory_space<vmem>>, vector<8x1xf32>
      tpu.vector_store %arg10[%c0_169, %c118_170], %198 {strides = array<i32>} : memref<8x768xf32, #tpu.memory_space<vmem>>, vector<8x1xf32>,
      %c0_171 = arith.constant 0 : index
      %c139 = arith.constant 139 : index
      %200 = vector.load %arg10[%c0_171, %c139] : memref<8x768xf32, #tpu.memory_space<vmem>>, vector<8x1xf32>
      %c0_172 = arith.constant 0 : index
      %c117 = arith.constant 117 : index
      %201 = vector.load %arg10[%c0_172, %c117] : memref<8x768xf32, #tpu.memory_space<vmem>>, vector<8x1xf32>
      tpu.vector_store %arg10[%c0_172, %c117], %200 {strides = array<i32>} : memref<8x768xf32, #tpu.memory_space<vmem>>, vector<8x1xf32>,
      %c0_173 = arith.constant 0 : index
      %c140 = arith.constant 140 : index
      %202 = vector.load %arg10[%c0_173, %c140] : memref<8x768xf32, #tpu.memory_space<vmem>>, vector<8x1xf32>
      %c0_174 = arith.constant 0 : index
      %c116_175 = arith.constant 116 : index
      %203 = vector.load %arg10[%c0_174, %c116_175] : memref<8x768xf32, #tpu.memory_space<vmem>>, vector<8x1xf32>
      tpu.vector_store %arg10[%c0_174, %c116_175], %202 {strides = array<i32>} : memref<8x768xf32, #tpu.memory_space<vmem>>, vector<8x1xf32>,
    } else {
    }
    %18 = arith.extui %1 : i1 to i32
    %c0_i32_10 = arith.constant 0 : i32
    %19 = arith.cmpi ne, %18, %c0_i32_10 : i32
    scf.if %19 {
      %c0_149 = arith.constant 0 : index
      %c638 = arith.constant 638 : index
      %180 = vector.load %arg10[%c0_149, %c638] : memref<8x768xf32, #tpu.memory_space<vmem>>, vector<8x1xf32>
      %c0_150 = arith.constant 0 : index
      %c640 = arith.constant 640 : index
      %181 = vector.load %arg10[%c0_150, %c640] : memref<8x768xf32, #tpu.memory_space<vmem>>, vector<8x1xf32>
      tpu.vector_store %arg10[%c0_150, %c640], %180 {strides = array<i32>} : memref<8x768xf32, #tpu.memory_space<vmem>>, vector<8x1xf32>,
      %c0_151 = arith.constant 0 : index
      %c637 = arith.constant 637 : index
      %182 = vector.load %arg10[%c0_151, %c637] : memref<8x768xf32, #tpu.memory_space<vmem>>, vector<8x1xf32>
      %c0_152 = arith.constant 0 : index
      %c641 = arith.constant 641 : index
      %183 = vector.load %arg10[%c0_152, %c641] : memref<8x768xf32, #tpu.memory_space<vmem>>, vector<8x1xf32>
      tpu.vector_store %arg10[%c0_152, %c641], %182 {strides = array<i32>} : memref<8x768xf32, #tpu.memory_space<vmem>>, vector<8x1xf32>,
      %c0_153 = arith.constant 0 : index
      %c636 = arith.constant 636 : index
      %184 = vector.load %arg10[%c0_153, %c636] : memref<8x768xf32, #tpu.memory_space<vmem>>, vector<8x1xf32>
      %c0_154 = arith.constant 0 : index
      %c642 = arith.constant 642 : index
      %185 = vector.load %arg10[%c0_154, %c642] : memref<8x768xf32, #tpu.memory_space<vmem>>, vector<8x1xf32>
      tpu.vector_store %arg10[%c0_154, %c642], %184 {strides = array<i32>} : memref<8x768xf32, #tpu.memory_space<vmem>>, vector<8x1xf32>,
      %c0_155 = arith.constant 0 : index
      %c635 = arith.constant 635 : index
      %186 = vector.load %arg10[%c0_155, %c635] : memref<8x768xf32, #tpu.memory_space<vmem>>, vector<8x1xf32>
      %c0_156 = arith.constant 0 : index
      %c643 = arith.constant 643 : index
      %187 = vector.load %arg10[%c0_156, %c643] : memref<8x768xf32, #tpu.memory_space<vmem>>, vector<8x1xf32>
      tpu.vector_store %arg10[%c0_156, %c643], %186 {strides = array<i32>} : memref<8x768xf32, #tpu.memory_space<vmem>>, vector<8x1xf32>,
      %c0_157 = arith.constant 0 : index
      %c634 = arith.constant 634 : index
      %188 = vector.load %arg10[%c0_157, %c634] : memref<8x768xf32, #tpu.memory_space<vmem>>, vector<8x1xf32>
      %c0_158 = arith.constant 0 : index
      %c644 = arith.constant 644 : index
      %189 = vector.load %arg10[%c0_158, %c644] : memref<8x768xf32, #tpu.memory_space<vmem>>, vector<8x1xf32>
      tpu.vector_store %arg10[%c0_158, %c644], %188 {strides = array<i32>} : memref<8x768xf32, #tpu.memory_space<vmem>>, vector<8x1xf32>,
      %c0_159 = arith.constant 0 : index
      %c633 = arith.constant 633 : index
      %190 = vector.load %arg10[%c0_159, %c633] : memref<8x768xf32, #tpu.memory_space<vmem>>, vector<8x1xf32>
      %c0_160 = arith.constant 0 : index
      %c645 = arith.constant 645 : index
      %191 = vector.load %arg10[%c0_160, %c645] : memref<8x768xf32, #tpu.memory_space<vmem>>, vector<8x1xf32>
      tpu.vector_store %arg10[%c0_160, %c645], %190 {strides = array<i32>} : memref<8x768xf32, #tpu.memory_space<vmem>>, vector<8x1xf32>,
      %c0_161 = arith.constant 0 : index
      %c632 = arith.constant 632 : index
      %192 = vector.load %arg10[%c0_161, %c632] : memref<8x768xf32, #tpu.memory_space<vmem>>, vector<8x1xf32>
      %c0_162 = arith.constant 0 : index
      %c646 = arith.constant 646 : index
      %193 = vector.load %arg10[%c0_162, %c646] : memref<8x768xf32, #tpu.memory_space<vmem>>, vector<8x1xf32>
      tpu.vector_store %arg10[%c0_162, %c646], %192 {strides = array<i32>} : memref<8x768xf32, #tpu.memory_space<vmem>>, vector<8x1xf32>,
      %c0_163 = arith.constant 0 : index
      %c631 = arith.constant 631 : index
      %194 = vector.load %arg10[%c0_163, %c631] : memref<8x768xf32, #tpu.memory_space<vmem>>, vector<8x1xf32>
      %c0_164 = arith.constant 0 : index
      %c647 = arith.constant 647 : index
      %195 = vector.load %arg10[%c0_164, %c647] : memref<8x768xf32, #tpu.memory_space<vmem>>, vector<8x1xf32>
      tpu.vector_store %arg10[%c0_164, %c647], %194 {strides = array<i32>} : memref<8x768xf32, #tpu.memory_space<vmem>>, vector<8x1xf32>,
      %c0_165 = arith.constant 0 : index
      %c630 = arith.constant 630 : index
      %196 = vector.load %arg10[%c0_165, %c630] : memref<8x768xf32, #tpu.memory_space<vmem>>, vector<8x1xf32>
      %c0_166 = arith.constant 0 : index
      %c648 = arith.constant 648 : index
      %197 = vector.load %arg10[%c0_166, %c648] : memref<8x768xf32, #tpu.memory_space<vmem>>, vector<8x1xf32>
      tpu.vector_store %arg10[%c0_166, %c648], %196 {strides = array<i32>} : memref<8x768xf32, #tpu.memory_space<vmem>>, vector<8x1xf32>,
      %c0_167 = arith.constant 0 : index
      %c629 = arith.constant 629 : index
      %198 = vector.load %arg10[%c0_167, %c629] : memref<8x768xf32, #tpu.memory_space<vmem>>, vector<8x1xf32>
      %c0_168 = arith.constant 0 : index
      %c649 = arith.constant 649 : index
      %199 = vector.load %arg10[%c0_168, %c649] : memref<8x768xf32, #tpu.memory_space<vmem>>, vector<8x1xf32>
      tpu.vector_store %arg10[%c0_168, %c649], %198 {strides = array<i32>} : memref<8x768xf32, #tpu.memory_space<vmem>>, vector<8x1xf32>,
      %c0_169 = arith.constant 0 : index
      %c628 = arith.constant 628 : index
      %200 = vector.load %arg10[%c0_169, %c628] : memref<8x768xf32, #tpu.memory_space<vmem>>, vector<8x1xf32>
      %c0_170 = arith.constant 0 : index
      %c650 = arith.constant 650 : index
      %201 = vector.load %arg10[%c0_170, %c650] : memref<8x768xf32, #tpu.memory_space<vmem>>, vector<8x1xf32>
      tpu.vector_store %arg10[%c0_170, %c650], %200 {strides = array<i32>} : memref<8x768xf32, #tpu.memory_space<vmem>>, vector<8x1xf32>,
      %c0_171 = arith.constant 0 : index
      %c627 = arith.constant 627 : index
      %202 = vector.load %arg10[%c0_171, %c627] : memref<8x768xf32, #tpu.memory_space<vmem>>, vector<8x1xf32>
      %c0_172 = arith.constant 0 : index
      %c651 = arith.constant 651 : index
      %203 = vector.load %arg10[%c0_172, %c651] : memref<8x768xf32, #tpu.memory_space<vmem>>, vector<8x1xf32>
      tpu.vector_store %arg10[%c0_172, %c651], %202 {strides = array<i32>} : memref<8x768xf32, #tpu.memory_space<vmem>>, vector<8x1xf32>,
    } else {
    }
    %c0_11 = arith.constant 0 : index
    %c116 = arith.constant 116 : index
    %20 = vector.load %arg10[%c0_11, %c116] : memref<8x768xf32, #tpu.memory_space<vmem>>, vector<8x536xf32>
    %cst_12 = arith.constant 0.000000e+00 : f32
    %21 = vector.broadcast %cst_12 : f32 to vector<8x536xf32>
    %22 = arith.cmpf oge, %20, %21 : vector<8x536xf32>
    %cst_13 = arith.constant 2.000000e-01 : f32
    %23 = vector.broadcast %cst_13 : f32 to vector<8x536xf32>
    %24 = arith.mulf %23, %20 : vector<8x536xf32>
    %25 = arith.select %22, %20, %24 : vector<8x536xi1>, vector<8x536xf32>
    %c0_14 = arith.constant 0 : index
    %c0_15 = arith.constant 0 : index
    %c0_16 = arith.constant 0 : index
    %26 = vector.load %arg5[%c0_14, %c0_15, %c0_16] : memref<9x8x8xf32, #tpu.memory_space<vmem>>, vector<1x8x8xf32>
    %27 = vector.shape_cast %26 : vector<1x8x8xf32> to vector<8x8xf32>
    %28 = vector.extract_strided_slice %25 {offsets = [0, 0], sizes = [8, 534], strides = [1, 1]} : vector<8x536xf32> to vector<8x534xf32>
    %cst_17 = arith.constant dense<0.000000e+00> : vector<8x534xf32>
    %29 = tpu.matmul %27, %28, %cst_17 {dimension_numbers = #tpu.dot_dimension_numbers<[1], [0], [0], [1], [0, 0, 1, 1], [], []>} : vector<8x8xf32>, vector<8x534xf32>, vector<8x534xf32> -> vector<8x534xf32>
    %c1 = arith.constant 1 : index
    %c0_18 = arith.constant 0 : index
    %c0_19 = arith.constant 0 : index
    %30 = vector.load %arg5[%c1, %c0_18, %c0_19] : memref<9x8x8xf32, #tpu.memory_space<vmem>>, vector<1x8x8xf32>
    %31 = vector.shape_cast %30 : vector<1x8x8xf32> to vector<8x8xf32>
    %32 = vector.extract_strided_slice %25 {offsets = [0, 1], sizes = [8, 534], strides = [1, 1]} : vector<8x536xf32> to vector<8x534xf32>
    %cst_20 = arith.constant dense<0.000000e+00> : vector<8x534xf32>
    %33 = tpu.matmul %31, %32, %cst_20 {dimension_numbers = #tpu.dot_dimension_numbers<[1], [0], [0], [1], [0, 0, 1, 1], [], []>} : vector<8x8xf32>, vector<8x534xf32>, vector<8x534xf32> -> vector<8x534xf32>
    %34 = arith.addf %29, %33 : vector<8x534xf32>
    %c2 = arith.constant 2 : index
    %c0_21 = arith.constant 0 : index
    %c0_22 = arith.constant 0 : index
    %35 = vector.load %arg5[%c2, %c0_21, %c0_22] : memref<9x8x8xf32, #tpu.memory_space<vmem>>, vector<1x8x8xf32>
    %36 = vector.shape_cast %35 : vector<1x8x8xf32> to vector<8x8xf32>
    %37 = vector.extract_strided_slice %25 {offsets = [0, 2], sizes = [8, 534], strides = [1, 1]} : vector<8x536xf32> to vector<8x534xf32>
    %cst_23 = arith.constant dense<0.000000e+00> : vector<8x534xf32>
    %38 = tpu.matmul %36, %37, %cst_23 {dimension_numbers = #tpu.dot_dimension_numbers<[1], [0], [0], [1], [0, 0, 1, 1], [], []>} : vector<8x8xf32>, vector<8x534xf32>, vector<8x534xf32> -> vector<8x534xf32>
    %39 = arith.addf %34, %38 : vector<8x534xf32>
    %c0_24 = arith.constant 0 : index
    %c0_25 = arith.constant 0 : index
    %c0_26 = arith.constant 0 : index
    %40 = vector.load %arg6[%c0_24, %c0_25, %c0_26] : memref<3x8x1xf32, #tpu.memory_space<vmem>>, vector<1x8x1xf32>
    %41 = vector.shape_cast %40 : vector<1x8x1xf32> to vector<8x1xf32>
    %42 = vector.broadcast %41 : vector<8x1xf32> to vector<8x534xf32>
    %43 = arith.addf %39, %42 : vector<8x534xf32>
    %c0_27 = arith.constant 0 : index
    %c0_28 = arith.constant 0 : index
    %44 = vector.load %arg11[%c0_27, %c0_28] : memref<8x536xf32, #tpu.memory_space<vmem>>, vector<8x534xf32>
    tpu.vector_store %arg11[%c0_27, %c0_28], %43 {strides = array<i32>} : memref<8x536xf32, #tpu.memory_space<vmem>>, vector<8x534xf32>,
    %45 = arith.extui %0 : i1 to i32
    %c0_i32_29 = arith.constant 0 : i32
    %46 = arith.cmpi ne, %45, %c0_i32_29 : i32
    scf.if %46 {
      %c0_149 = arith.constant 0 : index
      %c12 = arith.constant 12 : index
      %180 = vector.load %arg11[%c0_149, %c12] : memref<8x536xf32, #tpu.memory_space<vmem>>, vector<8x1xf32>
      %c0_150 = arith.constant 0 : index
      %c10 = arith.constant 10 : index
      %181 = vector.load %arg11[%c0_150, %c10] : memref<8x536xf32, #tpu.memory_space<vmem>>, vector<8x1xf32>
      tpu.vector_store %arg11[%c0_150, %c10], %180 {strides = array<i32>} : memref<8x536xf32, #tpu.memory_space<vmem>>, vector<8x1xf32>,
    } else {
    }
    %47 = arith.extui %1 : i1 to i32
    %c0_i32_30 = arith.constant 0 : i32
    %48 = arith.cmpi ne, %47, %c0_i32_30 : i32
    scf.if %48 {
      %c0_149 = arith.constant 0 : index
      %c521 = arith.constant 521 : index
      %180 = vector.load %arg11[%c0_149, %c521] : memref<8x536xf32, #tpu.memory_space<vmem>>, vector<8x1xf32>
      %c0_150 = arith.constant 0 : index
      %c523 = arith.constant 523 : index
      %181 = vector.load %arg11[%c0_150, %c523] : memref<8x536xf32, #tpu.memory_space<vmem>>, vector<8x1xf32>
      tpu.vector_store %arg11[%c0_150, %c523], %180 {strides = array<i32>} : memref<8x536xf32, #tpu.memory_space<vmem>>, vector<8x1xf32>,
    } else {
    }
    %c0_31 = arith.constant 0 : index
    %c0_32 = arith.constant 0 : index
    %c0_33 = arith.constant 0 : index
    %49 = vector.load %arg7[%c0_31, %c0_32, %c0_33] : memref<9x8x8xf32, #tpu.memory_space<vmem>>, vector<1x8x8xf32>
    %50 = vector.shape_cast %49 : vector<1x8x8xf32> to vector<8x8xf32>
    %c0_34 = arith.constant 0 : index
    %c0_35 = arith.constant 0 : index
    %51 = vector.load %arg11[%c0_34, %c0_35] : memref<8x536xf32, #tpu.memory_space<vmem>>, vector<8x532xf32>
    %cst_36 = arith.constant dense<0.000000e+00> : vector<8x532xf32>
    %52 = tpu.matmul %50, %51, %cst_36 {dimension_numbers = #tpu.dot_dimension_numbers<[1], [0], [0], [1], [0, 0, 1, 1], [], []>} : vector<8x8xf32>, vector<8x532xf32>, vector<8x532xf32> -> vector<8x532xf32>
    %c1_37 = arith.constant 1 : index
    %c0_38 = arith.constant 0 : index
    %c0_39 = arith.constant 0 : index
    %53 = vector.load %arg7[%c1_37, %c0_38, %c0_39] : memref<9x8x8xf32, #tpu.memory_space<vmem>>, vector<1x8x8xf32>
    %54 = vector.shape_cast %53 : vector<1x8x8xf32> to vector<8x8xf32>
    %c0_40 = arith.constant 0 : index
    %c1_41 = arith.constant 1 : index
    %55 = vector.load %arg11[%c0_40, %c1_41] : memref<8x536xf32, #tpu.memory_space<vmem>>, vector<8x532xf32>
    %cst_42 = arith.constant dense<0.000000e+00> : vector<8x532xf32>
    %56 = tpu.matmul %54, %55, %cst_42 {dimension_numbers = #tpu.dot_dimension_numbers<[1], [0], [0], [1], [0, 0, 1, 1], [], []>} : vector<8x8xf32>, vector<8x532xf32>, vector<8x532xf32> -> vector<8x532xf32>
    %57 = arith.addf %52, %56 : vector<8x532xf32>
    %c2_43 = arith.constant 2 : index
    %c0_44 = arith.constant 0 : index
    %c0_45 = arith.constant 0 : index
    %58 = vector.load %arg7[%c2_43, %c0_44, %c0_45] : memref<9x8x8xf32, #tpu.memory_space<vmem>>, vector<1x8x8xf32>
    %59 = vector.shape_cast %58 : vector<1x8x8xf32> to vector<8x8xf32>
    %c0_46 = arith.constant 0 : index
    %c2_47 = arith.constant 2 : index
    %60 = vector.load %arg11[%c0_46, %c2_47] : memref<8x536xf32, #tpu.memory_space<vmem>>, vector<8x532xf32>
    %cst_48 = arith.constant dense<0.000000e+00> : vector<8x532xf32>
    %61 = tpu.matmul %59, %60, %cst_48 {dimension_numbers = #tpu.dot_dimension_numbers<[1], [0], [0], [1], [0, 0, 1, 1], [], []>} : vector<8x8xf32>, vector<8x532xf32>, vector<8x532xf32> -> vector<8x532xf32>
    %62 = arith.addf %57, %61 : vector<8x532xf32>
    %c0_49 = arith.constant 0 : index
    %c0_50 = arith.constant 0 : index
    %c0_51 = arith.constant 0 : index
    %63 = vector.load %arg8[%c0_49, %c0_50, %c0_51] : memref<3x8x1xf32, #tpu.memory_space<vmem>>, vector<1x8x1xf32>
    %64 = vector.shape_cast %63 : vector<1x8x1xf32> to vector<8x1xf32>
    %65 = vector.broadcast %64 : vector<8x1xf32> to vector<8x532xf32>
    %66 = arith.addf %62, %65 : vector<8x532xf32>
    %c0_52 = arith.constant 0 : index
    %c118 = arith.constant 118 : index
    %67 = vector.load %arg10[%c0_52, %c118] : memref<8x768xf32, #tpu.memory_space<vmem>>, vector<8x532xf32>
    %68 = arith.addf %67, %66 : vector<8x532xf32>
    %c0_53 = arith.constant 0 : index
    %c118_54 = arith.constant 118 : index
    %69 = vector.load %arg10[%c0_53, %c118_54] : memref<8x768xf32, #tpu.memory_space<vmem>>, vector<8x532xf32>
    tpu.vector_store %arg10[%c0_53, %c118_54], %68 {strides = array<i32>} : memref<8x768xf32, #tpu.memory_space<vmem>>, vector<8x532xf32>,
    %70 = arith.extui %0 : i1 to i32
    %c0_i32_55 = arith.constant 0 : i32
    %71 = arith.cmpi ne, %70, %c0_i32_55 : i32
    scf.if %71 {
      %c0_149 = arith.constant 0 : index
      %c129 = arith.constant 129 : index
      %180 = vector.load %arg10[%c0_149, %c129] : memref<8x768xf32, #tpu.memory_space<vmem>>, vector<8x1xf32>
      %c0_150 = arith.constant 0 : index
      %c127 = arith.constant 127 : index
      %181 = vector.load %arg10[%c0_150, %c127] : memref<8x768xf32, #tpu.memory_space<vmem>>, vector<8x1xf32>
      tpu.vector_store %arg10[%c0_150, %c127], %180 {strides = array<i32>} : memref<8x768xf32, #tpu.memory_space<vmem>>, vector<8x1xf32>,
      %c0_151 = arith.constant 0 : index
      %c130 = arith.constant 130 : index
      %182 = vector.load %arg10[%c0_151, %c130] : memref<8x768xf32, #tpu.memory_space<vmem>>, vector<8x1xf32>
      %c0_152 = arith.constant 0 : index
      %c126 = arith.constant 126 : index
      %183 = vector.load %arg10[%c0_152, %c126] : memref<8x768xf32, #tpu.memory_space<vmem>>, vector<8x1xf32>
      tpu.vector_store %arg10[%c0_152, %c126], %182 {strides = array<i32>} : memref<8x768xf32, #tpu.memory_space<vmem>>, vector<8x1xf32>,
      %c0_153 = arith.constant 0 : index
      %c131 = arith.constant 131 : index
      %184 = vector.load %arg10[%c0_153, %c131] : memref<8x768xf32, #tpu.memory_space<vmem>>, vector<8x1xf32>
      %c0_154 = arith.constant 0 : index
      %c125 = arith.constant 125 : index
      %185 = vector.load %arg10[%c0_154, %c125] : memref<8x768xf32, #tpu.memory_space<vmem>>, vector<8x1xf32>
      tpu.vector_store %arg10[%c0_154, %c125], %184 {strides = array<i32>} : memref<8x768xf32, #tpu.memory_space<vmem>>, vector<8x1xf32>,
    } else {
    }
    %72 = arith.extui %1 : i1 to i32
    %c0_i32_56 = arith.constant 0 : i32
    %73 = arith.cmpi ne, %72, %c0_i32_56 : i32
    scf.if %73 {
      %c0_149 = arith.constant 0 : index
      %c638 = arith.constant 638 : index
      %180 = vector.load %arg10[%c0_149, %c638] : memref<8x768xf32, #tpu.memory_space<vmem>>, vector<8x1xf32>
      %c0_150 = arith.constant 0 : index
      %c640 = arith.constant 640 : index
      %181 = vector.load %arg10[%c0_150, %c640] : memref<8x768xf32, #tpu.memory_space<vmem>>, vector<8x1xf32>
      tpu.vector_store %arg10[%c0_150, %c640], %180 {strides = array<i32>} : memref<8x768xf32, #tpu.memory_space<vmem>>, vector<8x1xf32>,
      %c0_151 = arith.constant 0 : index
      %c637 = arith.constant 637 : index
      %182 = vector.load %arg10[%c0_151, %c637] : memref<8x768xf32, #tpu.memory_space<vmem>>, vector<8x1xf32>
      %c0_152 = arith.constant 0 : index
      %c641 = arith.constant 641 : index
      %183 = vector.load %arg10[%c0_152, %c641] : memref<8x768xf32, #tpu.memory_space<vmem>>, vector<8x1xf32>
      tpu.vector_store %arg10[%c0_152, %c641], %182 {strides = array<i32>} : memref<8x768xf32, #tpu.memory_space<vmem>>, vector<8x1xf32>,
      %c0_153 = arith.constant 0 : index
      %c636 = arith.constant 636 : index
      %184 = vector.load %arg10[%c0_153, %c636] : memref<8x768xf32, #tpu.memory_space<vmem>>, vector<8x1xf32>
      %c0_154 = arith.constant 0 : index
      %c642 = arith.constant 642 : index
      %185 = vector.load %arg10[%c0_154, %c642] : memref<8x768xf32, #tpu.memory_space<vmem>>, vector<8x1xf32>
      tpu.vector_store %arg10[%c0_154, %c642], %184 {strides = array<i32>} : memref<8x768xf32, #tpu.memory_space<vmem>>, vector<8x1xf32>,
    } else {
    }
    %c0_57 = arith.constant 0 : index
    %c118_58 = arith.constant 118 : index
    %74 = vector.load %arg10[%c0_57, %c118_58] : memref<8x768xf32, #tpu.memory_space<vmem>>, vector<8x532xf32>
    %cst_59 = arith.constant 0.000000e+00 : f32
    %75 = vector.broadcast %cst_59 : f32 to vector<8x532xf32>
    %76 = arith.cmpf oge, %74, %75 : vector<8x532xf32>
    %cst_60 = arith.constant 2.000000e-01 : f32
    %77 = vector.broadcast %cst_60 : f32 to vector<8x532xf32>
    %78 = arith.mulf %77, %74 : vector<8x532xf32>
    %79 = arith.select %76, %74, %78 : vector<8x532xi1>, vector<8x532xf32>
    %c3 = arith.constant 3 : index
    %c0_61 = arith.constant 0 : index
    %c0_62 = arith.constant 0 : index
    %80 = vector.load %arg5[%c3, %c0_61, %c0_62] : memref<9x8x8xf32, #tpu.memory_space<vmem>>, vector<1x8x8xf32>
    %81 = vector.shape_cast %80 : vector<1x8x8xf32> to vector<8x8xf32>
    %82 = vector.extract_strided_slice %79 {offsets = [0, 0], sizes = [8, 526], strides = [1, 1]} : vector<8x532xf32> to vector<8x526xf32>
    %cst_63 = arith.constant dense<0.000000e+00> : vector<8x526xf32>
    %83 = tpu.matmul %81, %82, %cst_63 {dimension_numbers = #tpu.dot_dimension_numbers<[1], [0], [0], [1], [0, 0, 1, 1], [], []>} : vector<8x8xf32>, vector<8x526xf32>, vector<8x526xf32> -> vector<8x526xf32>
    %c4 = arith.constant 4 : index
    %c0_64 = arith.constant 0 : index
    %c0_65 = arith.constant 0 : index
    %84 = vector.load %arg5[%c4, %c0_64, %c0_65] : memref<9x8x8xf32, #tpu.memory_space<vmem>>, vector<1x8x8xf32>
    %85 = vector.shape_cast %84 : vector<1x8x8xf32> to vector<8x8xf32>
    %86 = vector.extract_strided_slice %79 {offsets = [0, 3], sizes = [8, 526], strides = [1, 1]} : vector<8x532xf32> to vector<8x526xf32>
    %cst_66 = arith.constant dense<0.000000e+00> : vector<8x526xf32>
    %87 = tpu.matmul %85, %86, %cst_66 {dimension_numbers = #tpu.dot_dimension_numbers<[1], [0], [0], [1], [0, 0, 1, 1], [], []>} : vector<8x8xf32>, vector<8x526xf32>, vector<8x526xf32> -> vector<8x526xf32>
    %88 = arith.addf %83, %87 : vector<8x526xf32>
    %c5 = arith.constant 5 : index
    %c0_67 = arith.constant 0 : index
    %c0_68 = arith.constant 0 : index
    %89 = vector.load %arg5[%c5, %c0_67, %c0_68] : memref<9x8x8xf32, #tpu.memory_space<vmem>>, vector<1x8x8xf32>
    %90 = vector.shape_cast %89 : vector<1x8x8xf32> to vector<8x8xf32>
    %91 = vector.extract_strided_slice %79 {offsets = [0, 6], sizes = [8, 526], strides = [1, 1]} : vector<8x532xf32> to vector<8x526xf32>
    %cst_69 = arith.constant dense<0.000000e+00> : vector<8x526xf32>
    %92 = tpu.matmul %90, %91, %cst_69 {dimension_numbers = #tpu.dot_dimension_numbers<[1], [0], [0], [1], [0, 0, 1, 1], [], []>} : vector<8x8xf32>, vector<8x526xf32>, vector<8x526xf32> -> vector<8x526xf32>
    %93 = arith.addf %88, %92 : vector<8x526xf32>
    %c1_70 = arith.constant 1 : index
    %c0_71 = arith.constant 0 : index
    %c0_72 = arith.constant 0 : index
    %94 = vector.load %arg6[%c1_70, %c0_71, %c0_72] : memref<3x8x1xf32, #tpu.memory_space<vmem>>, vector<1x8x1xf32>
    %95 = vector.shape_cast %94 : vector<1x8x1xf32> to vector<8x1xf32>
    %96 = vector.broadcast %95 : vector<8x1xf32> to vector<8x526xf32>
    %97 = arith.addf %93, %96 : vector<8x526xf32>
    %c0_73 = arith.constant 0 : index
    %c0_74 = arith.constant 0 : index
    %98 = vector.load %arg11[%c0_73, %c0_74] : memref<8x536xf32, #tpu.memory_space<vmem>>, vector<8x526xf32>
    tpu.vector_store %arg11[%c0_73, %c0_74], %97 {strides = array<i32>} : memref<8x536xf32, #tpu.memory_space<vmem>>, vector<8x526xf32>,
    %99 = arith.extui %0 : i1 to i32
    %c0_i32_75 = arith.constant 0 : i32
    %100 = arith.cmpi ne, %99, %c0_i32_75 : i32
    scf.if %100 {
      %c0_149 = arith.constant 0 : index
      %c8_150 = arith.constant 8 : index
      %180 = vector.load %arg11[%c0_149, %c8_150] : memref<8x536xf32, #tpu.memory_space<vmem>>, vector<8x1xf32>
      %c0_151 = arith.constant 0 : index
      %c6_152 = arith.constant 6 : index
      %181 = vector.load %arg11[%c0_151, %c6_152] : memref<8x536xf32, #tpu.memory_space<vmem>>, vector<8x1xf32>
      tpu.vector_store %arg11[%c0_151, %c6_152], %180 {strides = array<i32>} : memref<8x536xf32, #tpu.memory_space<vmem>>, vector<8x1xf32>,
    } else {
    }
    %101 = arith.extui %1 : i1 to i32
    %c0_i32_76 = arith.constant 0 : i32
    %102 = arith.cmpi ne, %101, %c0_i32_76 : i32
    scf.if %102 {
      %c0_149 = arith.constant 0 : index
      %c517 = arith.constant 517 : index
      %180 = vector.load %arg11[%c0_149, %c517] : memref<8x536xf32, #tpu.memory_space<vmem>>, vector<8x1xf32>
      %c0_150 = arith.constant 0 : index
      %c519 = arith.constant 519 : index
      %181 = vector.load %arg11[%c0_150, %c519] : memref<8x536xf32, #tpu.memory_space<vmem>>, vector<8x1xf32>
      tpu.vector_store %arg11[%c0_150, %c519], %180 {strides = array<i32>} : memref<8x536xf32, #tpu.memory_space<vmem>>, vector<8x1xf32>,
    } else {
    }
    %c3_77 = arith.constant 3 : index
    %c0_78 = arith.constant 0 : index
    %c0_79 = arith.constant 0 : index
    %103 = vector.load %arg7[%c3_77, %c0_78, %c0_79] : memref<9x8x8xf32, #tpu.memory_space<vmem>>, vector<1x8x8xf32>
    %104 = vector.shape_cast %103 : vector<1x8x8xf32> to vector<8x8xf32>
    %c0_80 = arith.constant 0 : index
    %c0_81 = arith.constant 0 : index
    %105 = vector.load %arg11[%c0_80, %c0_81] : memref<8x536xf32, #tpu.memory_space<vmem>>, vector<8x524xf32>
    %cst_82 = arith.constant dense<0.000000e+00> : vector<8x524xf32>
    %106 = tpu.matmul %104, %105, %cst_82 {dimension_numbers = #tpu.dot_dimension_numbers<[1], [0], [0], [1], [0, 0, 1, 1], [], []>} : vector<8x8xf32>, vector<8x524xf32>, vector<8x524xf32> -> vector<8x524xf32>
    %c4_83 = arith.constant 4 : index
    %c0_84 = arith.constant 0 : index
    %c0_85 = arith.constant 0 : index
    %107 = vector.load %arg7[%c4_83, %c0_84, %c0_85] : memref<9x8x8xf32, #tpu.memory_space<vmem>>, vector<1x8x8xf32>
    %108 = vector.shape_cast %107 : vector<1x8x8xf32> to vector<8x8xf32>
    %c0_86 = arith.constant 0 : index
    %c1_87 = arith.constant 1 : index
    %109 = vector.load %arg11[%c0_86, %c1_87] : memref<8x536xf32, #tpu.memory_space<vmem>>, vector<8x524xf32>
    %cst_88 = arith.constant dense<0.000000e+00> : vector<8x524xf32>
    %110 = tpu.matmul %108, %109, %cst_88 {dimension_numbers = #tpu.dot_dimension_numbers<[1], [0], [0], [1], [0, 0, 1, 1], [], []>} : vector<8x8xf32>, vector<8x524xf32>, vector<8x524xf32> -> vector<8x524xf32>
    %111 = arith.addf %106, %110 : vector<8x524xf32>
    %c5_89 = arith.constant 5 : index
    %c0_90 = arith.constant 0 : index
    %c0_91 = arith.constant 0 : index
    %112 = vector.load %arg7[%c5_89, %c0_90, %c0_91] : memref<9x8x8xf32, #tpu.memory_space<vmem>>, vector<1x8x8xf32>
    %113 = vector.shape_cast %112 : vector<1x8x8xf32> to vector<8x8xf32>
    %c0_92 = arith.constant 0 : index
    %c2_93 = arith.constant 2 : index
    %114 = vector.load %arg11[%c0_92, %c2_93] : memref<8x536xf32, #tpu.memory_space<vmem>>, vector<8x524xf32>
    %cst_94 = arith.constant dense<0.000000e+00> : vector<8x524xf32>
    %115 = tpu.matmul %113, %114, %cst_94 {dimension_numbers = #tpu.dot_dimension_numbers<[1], [0], [0], [1], [0, 0, 1, 1], [], []>} : vector<8x8xf32>, vector<8x524xf32>, vector<8x524xf32> -> vector<8x524xf32>
    %116 = arith.addf %111, %115 : vector<8x524xf32>
    %c1_95 = arith.constant 1 : index
    %c0_96 = arith.constant 0 : index
    %c0_97 = arith.constant 0 : index
    %117 = vector.load %arg8[%c1_95, %c0_96, %c0_97] : memref<3x8x1xf32, #tpu.memory_space<vmem>>, vector<1x8x1xf32>
    %118 = vector.shape_cast %117 : vector<1x8x1xf32> to vector<8x1xf32>
    %119 = vector.broadcast %118 : vector<8x1xf32> to vector<8x524xf32>
    %120 = arith.addf %116, %119 : vector<8x524xf32>
    %c0_98 = arith.constant 0 : index
    %c122 = arith.constant 122 : index
    %121 = vector.load %arg10[%c0_98, %c122] : memref<8x768xf32, #tpu.memory_space<vmem>>, vector<8x524xf32>
    %122 = arith.addf %121, %120 : vector<8x524xf32>
    %c0_99 = arith.constant 0 : index
    %c122_100 = arith.constant 122 : index
    %123 = vector.load %arg10[%c0_99, %c122_100] : memref<8x768xf32, #tpu.memory_space<vmem>>, vector<8x524xf32>
    tpu.vector_store %arg10[%c0_99, %c122_100], %122 {strides = array<i32>} : memref<8x768xf32, #tpu.memory_space<vmem>>, vector<8x524xf32>,
    %124 = arith.extui %0 : i1 to i32
    %c0_i32_101 = arith.constant 0 : i32
    %125 = arith.cmpi ne, %124, %c0_i32_101 : i32
    scf.if %125 {
      %c0_149 = arith.constant 0 : index
      %c129 = arith.constant 129 : index
      %180 = vector.load %arg10[%c0_149, %c129] : memref<8x768xf32, #tpu.memory_space<vmem>>, vector<8x1xf32>
      %c0_150 = arith.constant 0 : index
      %c127 = arith.constant 127 : index
      %181 = vector.load %arg10[%c0_150, %c127] : memref<8x768xf32, #tpu.memory_space<vmem>>, vector<8x1xf32>
      tpu.vector_store %arg10[%c0_150, %c127], %180 {strides = array<i32>} : memref<8x768xf32, #tpu.memory_space<vmem>>, vector<8x1xf32>,
      %c0_151 = arith.constant 0 : index
      %c130 = arith.constant 130 : index
      %182 = vector.load %arg10[%c0_151, %c130] : memref<8x768xf32, #tpu.memory_space<vmem>>, vector<8x1xf32>
      %c0_152 = arith.constant 0 : index
      %c126 = arith.constant 126 : index
      %183 = vector.load %arg10[%c0_152, %c126] : memref<8x768xf32, #tpu.memory_space<vmem>>, vector<8x1xf32>
      tpu.vector_store %arg10[%c0_152, %c126], %182 {strides = array<i32>} : memref<8x768xf32, #tpu.memory_space<vmem>>, vector<8x1xf32>,
      %c0_153 = arith.constant 0 : index
      %c131 = arith.constant 131 : index
      %184 = vector.load %arg10[%c0_153, %c131] : memref<8x768xf32, #tpu.memory_space<vmem>>, vector<8x1xf32>
      %c0_154 = arith.constant 0 : index
      %c125 = arith.constant 125 : index
      %185 = vector.load %arg10[%c0_154, %c125] : memref<8x768xf32, #tpu.memory_space<vmem>>, vector<8x1xf32>
      tpu.vector_store %arg10[%c0_154, %c125], %184 {strides = array<i32>} : memref<8x768xf32, #tpu.memory_space<vmem>>, vector<8x1xf32>,
      %c0_155 = arith.constant 0 : index
      %c132 = arith.constant 132 : index
      %186 = vector.load %arg10[%c0_155, %c132] : memref<8x768xf32, #tpu.memory_space<vmem>>, vector<8x1xf32>
      %c0_156 = arith.constant 0 : index
      %c124 = arith.constant 124 : index
      %187 = vector.load %arg10[%c0_156, %c124] : memref<8x768xf32, #tpu.memory_space<vmem>>, vector<8x1xf32>
      tpu.vector_store %arg10[%c0_156, %c124], %186 {strides = array<i32>} : memref<8x768xf32, #tpu.memory_space<vmem>>, vector<8x1xf32>,
      %c0_157 = arith.constant 0 : index
      %c133 = arith.constant 133 : index
      %188 = vector.load %arg10[%c0_157, %c133] : memref<8x768xf32, #tpu.memory_space<vmem>>, vector<8x1xf32>
      %c0_158 = arith.constant 0 : index
      %c123 = arith.constant 123 : index
      %189 = vector.load %arg10[%c0_158, %c123] : memref<8x768xf32, #tpu.memory_space<vmem>>, vector<8x1xf32>
      tpu.vector_store %arg10[%c0_158, %c123], %188 {strides = array<i32>} : memref<8x768xf32, #tpu.memory_space<vmem>>, vector<8x1xf32>,
    } else {
    }
    %126 = arith.extui %1 : i1 to i32
    %c0_i32_102 = arith.constant 0 : i32
    %127 = arith.cmpi ne, %126, %c0_i32_102 : i32
    scf.if %127 {
      %c0_149 = arith.constant 0 : index
      %c638 = arith.constant 638 : index
      %180 = vector.load %arg10[%c0_149, %c638] : memref<8x768xf32, #tpu.memory_space<vmem>>, vector<8x1xf32>
      %c0_150 = arith.constant 0 : index
      %c640 = arith.constant 640 : index
      %181 = vector.load %arg10[%c0_150, %c640] : memref<8x768xf32, #tpu.memory_space<vmem>>, vector<8x1xf32>
      tpu.vector_store %arg10[%c0_150, %c640], %180 {strides = array<i32>} : memref<8x768xf32, #tpu.memory_space<vmem>>, vector<8x1xf32>,
      %c0_151 = arith.constant 0 : index
      %c637 = arith.constant 637 : index
      %182 = vector.load %arg10[%c0_151, %c637] : memref<8x768xf32, #tpu.memory_space<vmem>>, vector<8x1xf32>
      %c0_152 = arith.constant 0 : index
      %c641 = arith.constant 641 : index
      %183 = vector.load %arg10[%c0_152, %c641] : memref<8x768xf32, #tpu.memory_space<vmem>>, vector<8x1xf32>
      tpu.vector_store %arg10[%c0_152, %c641], %182 {strides = array<i32>} : memref<8x768xf32, #tpu.memory_space<vmem>>, vector<8x1xf32>,
      %c0_153 = arith.constant 0 : index
      %c636 = arith.constant 636 : index
      %184 = vector.load %arg10[%c0_153, %c636] : memref<8x768xf32, #tpu.memory_space<vmem>>, vector<8x1xf32>
      %c0_154 = arith.constant 0 : index
      %c642 = arith.constant 642 : index
      %185 = vector.load %arg10[%c0_154, %c642] : memref<8x768xf32, #tpu.memory_space<vmem>>, vector<8x1xf32>
      tpu.vector_store %arg10[%c0_154, %c642], %184 {strides = array<i32>} : memref<8x768xf32, #tpu.memory_space<vmem>>, vector<8x1xf32>,
      %c0_155 = arith.constant 0 : index
      %c635 = arith.constant 635 : index
      %186 = vector.load %arg10[%c0_155, %c635] : memref<8x768xf32, #tpu.memory_space<vmem>>, vector<8x1xf32>
      %c0_156 = arith.constant 0 : index
      %c643 = arith.constant 643 : index
      %187 = vector.load %arg10[%c0_156, %c643] : memref<8x768xf32, #tpu.memory_space<vmem>>, vector<8x1xf32>
      tpu.vector_store %arg10[%c0_156, %c643], %186 {strides = array<i32>} : memref<8x768xf32, #tpu.memory_space<vmem>>, vector<8x1xf32>,
      %c0_157 = arith.constant 0 : index
      %c634 = arith.constant 634 : index
      %188 = vector.load %arg10[%c0_157, %c634] : memref<8x768xf32, #tpu.memory_space<vmem>>, vector<8x1xf32>
      %c0_158 = arith.constant 0 : index
      %c644 = arith.constant 644 : index
      %189 = vector.load %arg10[%c0_158, %c644] : memref<8x768xf32, #tpu.memory_space<vmem>>, vector<8x1xf32>
      tpu.vector_store %arg10[%c0_158, %c644], %188 {strides = array<i32>} : memref<8x768xf32, #tpu.memory_space<vmem>>, vector<8x1xf32>,
    } else {
    }
    %c0_103 = arith.constant 0 : index
    %c122_104 = arith.constant 122 : index
    %128 = vector.load %arg10[%c0_103, %c122_104] : memref<8x768xf32, #tpu.memory_space<vmem>>, vector<8x524xf32>
    %cst_105 = arith.constant 0.000000e+00 : f32
    %129 = vector.broadcast %cst_105 : f32 to vector<8x524xf32>
    %130 = arith.cmpf oge, %128, %129 : vector<8x524xf32>
    %cst_106 = arith.constant 2.000000e-01 : f32
    %131 = vector.broadcast %cst_106 : f32 to vector<8x524xf32>
    %132 = arith.mulf %131, %128 : vector<8x524xf32>
    %133 = arith.select %130, %128, %132 : vector<8x524xi1>, vector<8x524xf32>
    %c6 = arith.constant 6 : index
    %c0_107 = arith.constant 0 : index
    %c0_108 = arith.constant 0 : index
    %134 = vector.load %arg5[%c6, %c0_107, %c0_108] : memref<9x8x8xf32, #tpu.memory_space<vmem>>, vector<1x8x8xf32>
    %135 = vector.shape_cast %134 : vector<1x8x8xf32> to vector<8x8xf32>
    %136 = vector.extract_strided_slice %133 {offsets = [0, 0], sizes = [8, 514], strides = [1, 1]} : vector<8x524xf32> to vector<8x514xf32>
    %cst_109 = arith.constant dense<0.000000e+00> : vector<8x514xf32>
    %137 = tpu.matmul %135, %136, %cst_109 {dimension_numbers = #tpu.dot_dimension_numbers<[1], [0], [0], [1], [0, 0, 1, 1], [], []>} : vector<8x8xf32>, vector<8x514xf32>, vector<8x514xf32> -> vector<8x514xf32>
    %c7 = arith.constant 7 : index
    %c0_110 = arith.constant 0 : index
    %c0_111 = arith.constant 0 : index
    %138 = vector.load %arg5[%c7, %c0_110, %c0_111] : memref<9x8x8xf32, #tpu.memory_space<vmem>>, vector<1x8x8xf32>
    %139 = vector.shape_cast %138 : vector<1x8x8xf32> to vector<8x8xf32>
    %140 = vector.extract_strided_slice %133 {offsets = [0, 5], sizes = [8, 514], strides = [1, 1]} : vector<8x524xf32> to vector<8x514xf32>
    %cst_112 = arith.constant dense<0.000000e+00> : vector<8x514xf32>
    %141 = tpu.matmul %139, %140, %cst_112 {dimension_numbers = #tpu.dot_dimension_numbers<[1], [0], [0], [1], [0, 0, 1, 1], [], []>} : vector<8x8xf32>, vector<8x514xf32>, vector<8x514xf32> -> vector<8x514xf32>
    %142 = arith.addf %137, %141 : vector<8x514xf32>
    %c8 = arith.constant 8 : index
    %c0_113 = arith.constant 0 : index
    %c0_114 = arith.constant 0 : index
    %143 = vector.load %arg5[%c8, %c0_113, %c0_114] : memref<9x8x8xf32, #tpu.memory_space<vmem>>, vector<1x8x8xf32>
    %144 = vector.shape_cast %143 : vector<1x8x8xf32> to vector<8x8xf32>
    %145 = vector.extract_strided_slice %133 {offsets = [0, 10], sizes = [8, 514], strides = [1, 1]} : vector<8x524xf32> to vector<8x514xf32>
    %cst_115 = arith.constant dense<0.000000e+00> : vector<8x514xf32>
    %146 = tpu.matmul %144, %145, %cst_115 {dimension_numbers = #tpu.dot_dimension_numbers<[1], [0], [0], [1], [0, 0, 1, 1], [], []>} : vector<8x8xf32>, vector<8x514xf32>, vector<8x514xf32> -> vector<8x514xf32>
    %147 = arith.addf %142, %146 : vector<8x514xf32>
    %c2_116 = arith.constant 2 : index
    %c0_117 = arith.constant 0 : index
    %c0_118 = arith.constant 0 : index
    %148 = vector.load %arg6[%c2_116, %c0_117, %c0_118] : memref<3x8x1xf32, #tpu.memory_space<vmem>>, vector<1x8x1xf32>
    %149 = vector.shape_cast %148 : vector<1x8x1xf32> to vector<8x1xf32>
    %150 = vector.broadcast %149 : vector<8x1xf32> to vector<8x514xf32>
    %151 = arith.addf %147, %150 : vector<8x514xf32>
    %c0_119 = arith.constant 0 : index
    %c0_120 = arith.constant 0 : index
    %152 = vector.load %arg11[%c0_119, %c0_120] : memref<8x536xf32, #tpu.memory_space<vmem>>, vector<8x514xf32>
    tpu.vector_store %arg11[%c0_119, %c0_120], %151 {strides = array<i32>} : memref<8x536xf32, #tpu.memory_space<vmem>>, vector<8x514xf32>,
    %153 = arith.extui %0 : i1 to i32
    %c0_i32_121 = arith.constant 0 : i32
    %154 = arith.cmpi ne, %153, %c0_i32_121 : i32
    scf.if %154 {
      %c0_149 = arith.constant 0 : index
      %c2_150 = arith.constant 2 : index
      %180 = vector.load %arg11[%c0_149, %c2_150] : memref<8x536xf32, #tpu.memory_space<vmem>>, vector<8x1xf32>
      %c0_151 = arith.constant 0 : index
      %c0_152 = arith.constant 0 : index
      %181 = vector.load %arg11[%c0_151, %c0_152] : memref<8x536xf32, #tpu.memory_space<vmem>>, vector<8x1xf32>
      tpu.vector_store %arg11[%c0_151, %c0_152], %180 {strides = array<i32>} : memref<8x536xf32, #tpu.memory_space<vmem>>, vector<8x1xf32>,
    } else {
    }
    %155 = arith.extui %1 : i1 to i32
    %c0_i32_122 = arith.constant 0 : i32
    %156 = arith.cmpi ne, %155, %c0_i32_122 : i32
    scf.if %156 {
      %c0_149 = arith.constant 0 : index
      %c511 = arith.constant 511 : index
      %180 = vector.load %arg11[%c0_149, %c511] : memref<8x536xf32, #tpu.memory_space<vmem>>, vector<8x1xf32>
      %c0_150 = arith.constant 0 : index
      %c513 = arith.constant 513 : index
      %181 = vector.load %arg11[%c0_150, %c513] : memref<8x536xf32, #tpu.memory_space<vmem>>, vector<8x1xf32>
      tpu.vector_store %arg11[%c0_150, %c513], %180 {strides = array<i32>} : memref<8x536xf32, #tpu.memory_space<vmem>>, vector<8x1xf32>,
    } else {
    }
    %c6_123 = arith.constant 6 : index
    %c0_124 = arith.constant 0 : index
    %c0_125 = arith.constant 0 : index
    %157 = vector.load %arg7[%c6_123, %c0_124, %c0_125] : memref<9x8x8xf32, #tpu.memory_space<vmem>>, vector<1x8x8xf32>
    %158 = vector.shape_cast %157 : vector<1x8x8xf32> to vector<8x8xf32>
    %c0_126 = arith.constant 0 : index
    %c0_127 = arith.constant 0 : index
    %159 = vector.load %arg11[%c0_126, %c0_127] : memref<8x536xf32, #tpu.memory_space<vmem>>, vector<8x512xf32>
    %cst_128 = arith.constant dense<0.000000e+00> : vector<8x512xf32>
    %160 = tpu.matmul %158, %159, %cst_128 {dimension_numbers = #tpu.dot_dimension_numbers<[1], [0], [0], [1], [0, 0, 1, 1], [], []>} : vector<8x8xf32>, vector<8x512xf32>, vector<8x512xf32> -> vector<8x512xf32>
    %c7_129 = arith.constant 7 : index
    %c0_130 = arith.constant 0 : index
    %c0_131 = arith.constant 0 : index
    %161 = vector.load %arg7[%c7_129, %c0_130, %c0_131] : memref<9x8x8xf32, #tpu.memory_space<vmem>>, vector<1x8x8xf32>
    %162 = vector.shape_cast %161 : vector<1x8x8xf32> to vector<8x8xf32>
    %c0_132 = arith.constant 0 : index
    %c1_133 = arith.constant 1 : index
    %163 = vector.load %arg11[%c0_132, %c1_133] : memref<8x536xf32, #tpu.memory_space<vmem>>, vector<8x512xf32>
    %cst_134 = arith.constant dense<0.000000e+00> : vector<8x512xf32>
    %164 = tpu.matmul %162, %163, %cst_134 {dimension_numbers = #tpu.dot_dimension_numbers<[1], [0], [0], [1], [0, 0, 1, 1], [], []>} : vector<8x8xf32>, vector<8x512xf32>, vector<8x512xf32> -> vector<8x512xf32>
    %165 = arith.addf %160, %164 : vector<8x512xf32>
    %c8_135 = arith.constant 8 : index
    %c0_136 = arith.constant 0 : index
    %c0_137 = arith.constant 0 : index
    %166 = vector.load %arg7[%c8_135, %c0_136, %c0_137] : memref<9x8x8xf32, #tpu.memory_space<vmem>>, vector<1x8x8xf32>
    %167 = vector.shape_cast %166 : vector<1x8x8xf32> to vector<8x8xf32>
    %c0_138 = arith.constant 0 : index
    %c2_139 = arith.constant 2 : index
    %168 = vector.load %arg11[%c0_138, %c2_139] : memref<8x536xf32, #tpu.memory_space<vmem>>, vector<8x512xf32>
    %cst_140 = arith.constant dense<0.000000e+00> : vector<8x512xf32>
    %169 = tpu.matmul %167, %168, %cst_140 {dimension_numbers = #tpu.dot_dimension_numbers<[1], [0], [0], [1], [0, 0, 1, 1], [], []>} : vector<8x8xf32>, vector<8x512xf32>, vector<8x512xf32> -> vector<8x512xf32>
    %170 = arith.addf %165, %169 : vector<8x512xf32>
    %c2_141 = arith.constant 2 : index
    %c0_142 = arith.constant 0 : index
    %c0_143 = arith.constant 0 : index
    %171 = vector.load %arg8[%c2_141, %c0_142, %c0_143] : memref<3x8x1xf32, #tpu.memory_space<vmem>>, vector<1x8x1xf32>
    %172 = vector.shape_cast %171 : vector<1x8x1xf32> to vector<8x1xf32>
    %173 = vector.broadcast %172 : vector<8x1xf32> to vector<8x512xf32>
    %174 = arith.addf %170, %173 : vector<8x512xf32>
    %c0_144 = arith.constant 0 : index
    %c128_145 = arith.constant 128 : index
    %175 = vector.load %arg10[%c0_144, %c128_145] : memref<8x768xf32, #tpu.memory_space<vmem>>, vector<8x512xf32>
    %176 = arith.addf %175, %174 : vector<8x512xf32>
    %c0_146 = arith.constant 0 : index
    %c0_147 = arith.constant 0 : index
    %c0_148 = arith.constant 0 : index
    %177 = vector.load %arg9[%c0_146, %c0_147, %c0_148] : memref<1x8x512xf32, #tpu.memory_space<vmem>>, vector<1x8x512xf32>
    %178 = vector.shape_cast %177 : vector<1x8x512xf32> to vector<8x512xf32>
    %179 = vector.shape_cast %176 : vector<8x512xf32> to vector<1x8x512xf32>
    tpu.vector_store %arg9[%c0_146, %c0_147, %c0_148], %179 {strides = array<i32>} : memref<1x8x512xf32, #tpu.memory_space<vmem>>, vector<1x8x512xf32>,
    return
  }
  func.func @transform_0(%arg0: i32, %arg1: i32) -> (i32, i32, i32) {
    %c0_i32 = arith.constant 0 : i32
    %c0_i32_0 = arith.constant 0 : i32
    return %arg0, %c0_i32, %arg1 : i32, i32, i32
  }
  func.func @transform_1(%arg0: i32, %arg1: i32) -> (i32, i32, i32) {
    %c4_i32 = arith.constant 4 : i32
    %0 = arith.muli %arg1, %c4_i32 : i32
    %c1_i32 = arith.constant 1 : i32
    %1 = arith.subi %0, %c1_i32 : i32
    %c0_i32 = arith.constant 0 : i32
    %2 = arith.maxsi %1, %c0_i32 : i32
    %c0_i32_0 = arith.constant 0 : i32
    %c0_i32_1 = arith.constant 0 : i32
    return %arg0, %c0_i32_0, %2 : i32, i32, i32
  }
  func.func @transform_2(%arg0: i32, %arg1: i32) -> (i32, i32, i32) {
    %c4_i32 = arith.constant 4 : i32
    %0 = arith.muli %arg1, %c4_i32 : i32
    %c4_i32_0 = arith.constant 4 : i32
    %1 = arith.addi %0, %c4_i32_0 : i32
    %c3_i32 = arith.constant 3 : i32
    %2 = arith.minsi %1, %c3_i32 : i32
    %c0_i32 = arith.constant 0 : i32
    %c0_i32_1 = arith.constant 0 : i32
    return %arg0, %c0_i32, %2 : i32, i32, i32
  }
  func.func @transform_3(%arg0: i32, %arg1: i32) -> (i32, i32, i32) {
    %c0_i32 = arith.constant 0 : i32
    %c0_i32_0 = arith.constant 0 : i32
    %c0_i32_1 = arith.constant 0 : i32
    %c0_i32_2 = arith.constant 0 : i32
    return %c0_i32, %c0_i32_0, %c0_i32_1 : i32, i32, i32
  }
  func.func @transform_4(%arg0: i32, %arg1: i32) -> (i32, i32, i32) {
    %c0_i32 = arith.constant 0 : i32
    %c0_i32_0 = arith.constant 0 : i32
    %c0_i32_1 = arith.constant 0 : i32
    %c0_i32_2 = arith.constant 0 : i32
    return %c0_i32, %c0_i32_0, %c0_i32_1 : i32, i32, i32
  }
  func.func @transform_5(%arg0: i32, %arg1: i32) -> (i32, i32, i32) {
    %c0_i32 = arith.constant 0 : i32
    %c0_i32_0 = arith.constant 0 : i32
    %c0_i32_1 = arith.constant 0 : i32
    %c0_i32_2 = arith.constant 0 : i32
    return %c0_i32, %c0_i32_0, %c0_i32_1 : i32, i32, i32
  }
  func.func @transform_6(%arg0: i32, %arg1: i32) -> (i32, i32, i32) {
    %c0_i32 = arith.constant 0 : i32
    %c0_i32_0 = arith.constant 0 : i32
    %c0_i32_1 = arith.constant 0 : i32
    %c0_i32_2 = arith.constant 0 : i32
    return %c0_i32, %c0_i32_0, %c0_i32_1 : i32, i32, i32
  }
  func.func @transform_7(%arg0: i32, %arg1: i32) -> (i32, i32, i32) {
    %c0_i32 = arith.constant 0 : i32
    %c0_i32_0 = arith.constant 0 : i32
    return %arg0, %c0_i32, %arg1 : i32, i32, i32
  }
}

</mosaic_0001>

<bundles_post_ra>
// kernel: tpu_custom_call.1
= control target key start
LH: loop header
LB: loop body
LE: loop exit
PB: predicated region body
PF: predicated region fallthrough
CT: control target
= control target key end

     0   :  { %12 = vsyncpa [#allocation5], 0  ;;  %s4579_s0 = inlined_call_operand.vmem [shape: f32[2,8,512], index: 0, kind: input, shape index: {}]   ;;  %s4580_s1 = inlined_call_operand.vmem [shape: f32[2,8,512], index: 1, kind: input, shape index: {}]   ;;  %s4581_s2 = inlined_call_operand.vmem [shape: f32[2,8,512], index: 2, kind: input, shape index: {}]   ;;  %s4582_s3 = inlined_call_operand.vmem [shape: f32[9,8,8], index: 3, kind: input, shape index: {}]   ;;  %s4583_s4 = inlined_call_operand.vmem [shape: f32[3,8,1], index: 4, kind: input, shape index: {}]   ;;  %s4584_s5 = inlined_call_operand.vmem [shape: f32[9,8,8], index: 5, kind: input, shape index: {}]   ;;  %s4585_s6 = inlined_call_operand.vmem [shape: f32[3,8,1], index: 6, kind: input, shape index: {}]   ;;  %s4586_s7 = inlined_call_operand.hbm [shape: f32[2,8,512], index: 7, kind: output, shape index: {}]  }
   0x1   :  { %14 = vsyncpa [#allocation5 + $0x1], 0  ;;  %s3953_s1 = smov 0   ;;  %s3955_s2 = smov 0  }
   0x2   :  { %s3957_s24 = smov 0   ;;  %s3959_s25 = smov 0  }
   0x3   :  { %s3961_s26 = smov 0   ;;  %s3963_s27 = smov 0  }
   0x4 LB: > { %s3418_s28 = sadd.s32 4294967295, %s3882_s27   ;;  %s3419_s29 = sadd.s32 4294967294, %s3882_s27   ;;  %s3882_s27 = sphi %s3963_s27, %s20_s27   ;;  %s3878_s26 = sphi %s3961_s26, %s4608_s26   ;;  %s3874_s25 = sphi %s3959_s25, %s4607_s25   ;;  %s3870_s24 = sphi %s3957_s24, %s4606_s24   ;;  %s3866_s2 = sphi %s3955_s2, %s4605_s2   ;;  %s3862_s1 = sphi %s3953_s1, %s4604_s1  }
   0x5   : > { %s32_s30 = sadd.s32 1, %s3878_s26  ;;  %s225_s8 = sadd.s32 1, %s3870_s24 }
   0x6   : > { %p34_p0 = scmp.ge.s32.totalorder %s32_s30, 2  ;;  %p235_p1 = scmp.ne.s32.totalorder %s3870_s24, %s3866_s2 }
   0x7   : > { %p236_p2 = scmp.eq.s32.totalorder %s3418_s28, 1  ;;  %p241_p3 = scmp.ne.s32.totalorder %s3866_s2, %s3862_s1 }
   0x8   : > { %s4610_s30 = smov (%p34_p0, %s32_s30), 0  ;;  %p242_p5 = scmp.eq.s32.totalorder %s3419_s29, 1 }
   0x9   : > { %p3993_p4 = por %p236_p2, %p235_p1  ;;  %s220_s10 = ssub.s32 %s3878_s26, %s4610_s30 }
   0xa   : > { %p3422_p6 = scmp.ge.s32.totalorder %s3882_s27, 1  ;;  %p223_p7 = scmp.eq.s32.totalorder %s220_s10, 0 }
   0xb   : > { %p4000_p8 = por %p242_p5, %p241_p3  ;;  %p323_p9 = scmp.lt.s32.totalorder %s3882_s27, 3 }
   0xc   : > { %s4006_s12 = scalar_select %p223_p7, %s3870_s24, %s225_s8  }
   0xd   : > { %p324_p10 = pnand %p3422_p6, %p323_p9 }
   0xe   : > { %p384_p11 = scmp.lt.s32.totalorder (!%p324_p10), %s3874_s25, 1  ;;  %s3884_s18 = smov (!%p324_p10), 126  }
   0xf   : > { %327 = sbr.rel (%p324_p10) target bundleno = 2672 (0xa70), region = 48  ;;  %s3885_s19 = smov (!%p324_p10), 122  }
  0x10   : > { %s3886_s20 = smov (!%p324_p10), 118   ;;  %s3887_s21 = smov (!%p324_p10), 124  }
  0x11   : > { %s4588_s22 = smov (!%p324_p10), 120   ;;  %s3889_s23 = smov (!%p324_p10), 116  }
  0x12   : > { %s3890_s28 = smov (!%p324_p10), 114   ;;  %s3891_s29 = smov (!%p324_p10), 112  }
  0x13   : > { %s3892_s8 = smov (!%p324_p10), 110   ;;  %s3893_s10 = smov (!%p324_p10), 2  }
  0x14   : > { %s385_s13 = scalar_select %p384_p11, %s3874_s25, 1  ;;  %vm475_vm6 = vcmask 1048568   ;;  %vm482_vm8 = vcmask 1040368   ;;  %vm489_vm9 = vcmask 1032168   ;;  %vm4594_vm10 = vcmask 1023968   ;;  %v3430_v59 = vld [vmem:[%s4582_s3 + $0x8] sm:$0xff] }
  0x15   : > { %s3896_s15 = smov 106   ;;  %s4589_s16 = smov 6   ;;  %vm4593_vm11 = vcmask 1015768   ;;  %vm510_vm12 = vcmask 1007568   ;;  %vm517_vm13 = vcmask 999368   ;;  %vm524_vm14 = vcmask 991168  }
  0x16   : > { %s3542_s14 = sshll.u32 %s385_s13, 5  ;;  %s3894_s13 = smov 108   ;;  %vm531_vm15 = vcmask 982968   ;;  %v4124_v63 = vld [vmem:[%s4582_s3] sm:$0xff] }
  0x17   : > { %s4013_s17 = scalar_lea.vmem %s4579_s0, %s3542_s14  ;;  %s3895_s14 = smov 4  }
  0x18   : > { %v427_v0 = vld [vmem:[%s4013_s17] sm:$0xff]  ;;  %v430_v3 = vld [vmem:[%s4013_s17 + $0x18] sm:$0xff]  ;;  %v428_v6 = vld [vmem:[%s4013_s17 + $0x8] sm:$0xff] }
  0x19   : > { %vm431_vm0 = vcmp.ge.f32.partialorder %v427_v0, 0.0  ;;  %v435_v1 = vmul.f32 0.2, %v427_v0  ;;  %v438_v4 = vmul.f32 0.2, %v430_v3  ;;  %vm434_vm1 = vcmp.ge.f32.partialorder %v430_v3, 0.0 }
  0x1a   : > { %v429_v7 = vld [vmem:[%s4013_s17 + $0x10] sm:$0xff]  ;;  %v436_v8 = vmul.f32 0.2, %v428_v6  ;;  %vm432_vm2 = vcmp.ge.f32.partialorder %v428_v6, 0.0  ;;  %s3908_s17 = smov 11  }
  0x1b   : > { %v4016_v2 = vsel %vm431_vm0, %v427_v0, %v435_v1  ;;  %v4033_v5 = vsel %vm434_vm1, %v430_v3, %v438_v4  ;;  %v437_v9 = vmul.f32 0.2, %v429_v7  ;;  %vm433_vm3 = vcmp.ge.f32.partialorder %v429_v7, 0.0 }
  0x1c   : > { %472 = vrot.lane.b32.xlu0 %v4016_v2, %s3884_s18  ;;  %486 = vrot.lane.b32.xlu1 %v4016_v2, %s3885_s19  ;;  %v4058_v11 = vsel %vm432_vm2, %v428_v6, %v436_v8  ;;  %v651_v21 = vmul.f32 0.2, %v4016_v2  ;;  %vm645_vm7 = vcmp.ge.f32.partialorder %v4016_v2, 0.0  ;;  %vm559_vm0 = vcmask 7168  }
  0x1d   : > { %500 = vrot.lane.b32.xlu2 %v4016_v2, %s3886_s20  ;;  %v4060_v12 = vsel %vm433_vm3, %v429_v7, %v437_v9  ;;  %vm646_vm4 = vcmp.ge.f32.partialorder %v4058_v11, 0.0  ;;  %v652_v13 = vmul.f32 0.2, %v4058_v11  ;;  %vm566_vm1 = vcmask 15368   ;;  %v1057_v9 = vld [vmem:[%s4583_s4] sm:$0xff] }
  0x1e   : > { %vm647_vm5 = vcmp.ge.f32.partialorder %v4060_v12, 0.0  ;;  %v653_v14 = vmul.f32 0.2, %v4060_v12  ;;  %v657_v22 = vsel %vm645_vm7, %v4016_v2, %v651_v21  ;;  %vm538_vm2 = vcmask 974768  }
  0x1f   : > { %v658_v15 = vsel %vm646_vm4, %v4058_v11, %v652_v13  ;;  %vm545_vm3 = vcmask 966568   ;;  %vm552_vm4 = vcmask 958368   ;;  %vm4592_vm7 = vcmask 31768  }
  0x20   : > { %v4068_v16 = vsel %vm647_vm5, %v4060_v12, %v653_v14  ;;  %v3636_v23 = vpack.i.bf16 %v658_v15, %v657_v22  ;;  %vm573_vm5 = vcmask 23568   ;;  %v654_v49 = vmul.f32 0.2, %v4033_v5 }
  0x21   : > { %v4071_v17 = vpack.i.bf16 %v4068_v16, %v658_v15  ;;  %v3909_v8 = vmov 0  }
  0x22   : > { %3671 = vset.pattern.permute.xlu1 %v3909_v8  ;;  %3732 = vset.pattern.permute.xlu2 %v3909_v8 }
  0x23   : > { %3748 = vset.pattern.permute.xlu0 %v3909_v8 }
  0x24   : > { %479 = vrot.lane.b32.xlu0 %v4016_v2, %s3887_s21  ;;  %493 = vrot.lane.b32.xlu1 %v4016_v2, %s4588_s22  ;;  %s3906_s22 = smov 22  }
  0x25   : > { %507 = vrot.lane.b32.xlu2 %v4016_v2, %s3889_s23  ;;  %s3898_s23 = smov 104  }
  0x2c   : > { %514 = vrot.lane.b32.xlu0 %v4016_v2, %s3890_s28  ;;  %521 = vrot.lane.b32.xlu1 %v4016_v2, %s3891_s29  ;;  %s4587_s28 = smov 8   ;;  %s3900_s29 = smov 10  }
  0x2d   : > { %528 = vrot.lane.b32.xlu2 %v4016_v2, %s3892_s8  ;;  %s3901_s8 = smov 12  }
  0x34   : > { %556 = vrot.lane.b32.xlu0 %v4033_v5, %s3893_s10  ;;  %535 = vrot.lane.b32.xlu1 %v4016_v2, %s3894_s13  ;;  %s3902_s13 = smov 14  }
  0x35   : > { %563 = vrot.lane.b32.xlu2 %v4033_v5, %s3895_s14 }
  0x3c   : > { %542 = vrot.lane.b32.xlu0 %v4016_v2, %s3896_s15  ;;  %570 = vrot.lane.b32.xlu1 %v4033_v5, %s4589_s16  ;;  %s3903_s15 = smov 16   ;;  %s3907_s16 = smov 24  }
  0x3d   : > { %549 = vrot.lane.b32.xlu2 %v4016_v2, %s3898_s23  ;;  %s3904_s23 = smov 18  }
  0x44   : > { %577 = vrot.lane.b32.xlu0 %v4033_v5, %s4587_s28  ;;  %584 = vrot.lane.b32.xlu1 %v4033_v5, %s3900_s29  ;;  %s3905_s28 = smov 20  }
  0x45   : > { %591 = vrot.lane.b32.xlu2 %v4033_v5, %s3901_s8 }
  0x4c   : > { %598 = vrot.lane.b32.xlu0 %v4033_v5, %s3902_s13  ;;  %605 = vrot.lane.b32.xlu1 %v4033_v5, %s3903_s15 }
  0x4d   : > { %612 = vrot.lane.b32.xlu2 %v4033_v5, %s3904_s23 }
  0x54   : > { %619 = vrot.lane.b32.xlu0 %v4033_v5, %s3905_s28  ;;  %626 = vrot.lane.b32.xlu1 %v4033_v5, %s3906_s22  ;;  %s3910_s22 = smov 127   ;;  %s4597_s28 = smov 6  }
  0x55   : > { %633 = vrot.lane.b32.xlu2 %v4033_v5, %s3907_s16  ;;  %s4598_s16 = smov 120  }
  0x5c   : > { %3632 = vrot.lane.b32.xlu0 %v4071_v17, %s3908_s17  ;;  %3637 = vrot.lane.b32.xlu1 %v3636_v23, %s3901_s8 }
  0x77   : > { %v501_v10 = vpop.permute.xlu2 %500 }
  0x7f   : > { %v508_v18 = vpop.permute.xlu2 %507 }
  0x87   : > { %v529_v24 = vpop.permute.xlu2 %528 }
  0x8e   : > { %v473_v19 = vpop.permute.xlu0 %472  ;;  %v487_v20 = vpop.permute.xlu1 %486 }
  0x8f   : > { %476 = vst.msk [vmem:[#allocation2] sm:$0xff] %vm475_vm6, %v473_v19  ;;  %v564_v27 = vpop.permute.xlu2 %563 }
  0x96   : > { %v480_v25 = vpop.permute.xlu0 %479  ;;  %v494_v26 = vpop.permute.xlu1 %493 }
  0x97   : > { %483 = vst.msk [vmem:[#allocation2] sm:$0xff] %vm482_vm8, %v480_v25  ;;  %v550_v32 = vpop.permute.xlu2 %549 }
  0x98   : > { %490 = vst.msk [vmem:[#allocation2] sm:$0xff] %vm489_vm9, %v487_v20 }
  0x99   : > { %497 = vst.msk [vmem:[#allocation2] sm:$0xff] %vm4594_vm10, %v494_v26 }
  0x9a   : > { %504 = vst.msk [vmem:[#allocation2] sm:$0xff] %vm4593_vm11, %v501_v10 }
  0x9b   : > { %511 = vst.msk [vmem:[#allocation2] sm:$0xff] %vm510_vm12, %v508_v18  ;;  %vm4591_vm12 = vcmask 39968   ;;  %v3441_v18 = vld [vmem:[%s4582_s3 + $0x10] sm:$0xff] }
  0x9e   : > { %v515_v28 = vpop.permute.xlu0 %514  ;;  %v522_v29 = vpop.permute.xlu1 %521 }
  0x9f   : > { %518 = vst.msk [vmem:[#allocation2] sm:$0xff] %vm517_vm13, %v515_v28  ;;  %v592_v35 = vpop.permute.xlu2 %591  ;;  %vm594_vm13 = vcmask 48168  }
  0xa0   : > { %525 = vst.msk [vmem:[#allocation2] sm:$0xff] %vm524_vm14, %v522_v29 }
  0xa1   : > { %532 = vst.msk [vmem:[#allocation2] sm:$0xff] %vm531_vm15, %v529_v24  ;;  %vm601_vm15 = vcmask 56368  }
  0xa6   : > { %v557_v30 = vpop.permute.xlu0 %556  ;;  %v536_v31 = vpop.permute.xlu1 %535 }
  0xa7   : > { %560 = vst.msk [vmem:[#allocation2 + $0x28] sm:$0xff] %vm559_vm0, %v557_v30  ;;  %v613_v43 = vpop.permute.xlu2 %612 }
  0xa8   : > { %567 = vst.msk [vmem:[#allocation2 + $0x28] sm:$0xff] %vm566_vm1, %v564_v27 }
  0xa9   : > { %539 = vst.msk [vmem:[#allocation2] sm:$0xff] %vm538_vm2, %v536_v31  ;;  %vm608_vm2 = vcmask 64568  }
  0xae   : > { %v543_v33 = vpop.permute.xlu0 %542  ;;  %v571_v34 = vpop.permute.xlu1 %570 }
  0xaf   : > { %546 = vst.msk [vmem:[#allocation2] sm:$0xff] %vm545_vm3, %v543_v33  ;;  %vm615_vm3 = vcmask 72768   ;;  %v634_v46 = vpop.permute.xlu2 %633 }
  0xb0   : > { %553 = vst.msk [vmem:[#allocation2] sm:$0xff] %vm552_vm4, %v550_v32  ;;  %vm622_vm4 = vcmask 80968  }
  0xb1   : > { %574 = vst.msk [vmem:[#allocation2 + $0x28] sm:$0xff] %vm573_vm5, %v571_v34 }
  0xb6   : > { %v578_v36 = vpop.permute.xlu0 %577  ;;  %v585_v37 = vpop.permute.xlu1 %584 }
  0xb7   : > { %581 = vst.msk [vmem:[#allocation2 + $0x28] sm:$0xff] %vm4592_vm7, %v578_v36  ;;  %v4088_v38 = vld [vmem:[#allocation2] sm:$0xff] }
  0xb8   : > { %588 = vst.msk [vmem:[#allocation2 + $0x28] sm:$0xff] %vm4591_vm12, %v585_v37  ;;  %vm644_vm14 = vcmp.ge.f32.partialorder %v4088_v38, 0.0  ;;  %v650_v39 = vmul.f32 0.2, %v4088_v38  ;;  %vm648_vm12 = vcmp.ge.f32.partialorder %v4033_v5, 0.0 }
  0xb9   : > { %595 = vst.msk [vmem:[#allocation2 + $0x28] sm:$0xff] %vm594_vm13, %v592_v35  ;;  %vm629_vm13 = vcmask 89168   ;;  %v660_v52 = vsel %vm648_vm12, %v4033_v5, %v654_v49  ;;  %vm810_vm12 = vcmask 97280  }
  0xba   : > { %v656_v40 = vsel %vm644_vm14, %v4088_v38, %v650_v39  ;;  %vm636_vm14 = vcmask 97368  }
  0xbb   : > { %798 = vrot.lane.b32.xlu1 %v656_v40, %s3901_s8  ;;  %v3646_v41 = vpack.i.bf16 %v657_v22, %v656_v40  ;;  %v3641_v42 = vpack.i.bf16 %v656_v40, %v657_v22 }
  0xbd   : > { %3647 = vrot.lane.b32.xlu0 %v3646_v41, %s3900_s29  ;;  %3642 = vrot.lane.b32.xlu2 %v3641_v42, %s3908_s17 }
  0xbe   : > { %v599_v44 = vpop.permute.xlu0 %598  ;;  %v606_v45 = vpop.permute.xlu1 %605 }
  0xbf   : > { %602 = vst.msk [vmem:[#allocation2 + $0x28] sm:$0xff] %vm601_vm15, %v599_v44 }
  0xc0   : > { %609 = vst.msk [vmem:[#allocation2 + $0x28] sm:$0xff] %vm608_vm2, %v606_v45 }
  0xc1   : > { %616 = vst.msk [vmem:[#allocation2 + $0x28] sm:$0xff] %vm615_vm3, %v613_v43  ;;  %vm683_vm3 = vcmask 89088  }
  0xc6   : > { %v620_v47 = vpop.permute.xlu0 %619  ;;  %v627_v48 = vpop.permute.xlu1 %626 }
  0xc7   : > { %623 = vst.msk [vmem:[#allocation2 + $0x28] sm:$0xff] %vm622_vm4, %v620_v47  ;;  %vm938_vm4 = vcmask 80896  }
  0xc8   : > { %630 = vst.msk [vmem:[#allocation2 + $0x28] sm:$0xff] %vm629_vm13, %v627_v48 }
  0xc9   : > { %637 = vst.msk [vmem:[#allocation2 + $0x28] sm:$0xff] %vm636_vm14, %v634_v46 }
  0xce   : > { %v3633_v55 = vpop.permute.xlu0 %3632  ;;  %v3638_v60 = vpop.permute.xlu1 %3637 }
  0xcf   : > { %v3635_v56 = vunpack.i.h.bf16 %v3633_v55  ;;  %v3634_v57 = vunpack.i.l.bf16 %v3633_v55  ;;  %v3640_v61 = vunpack.i.h.bf16 %v3638_v60  ;;  %v3639_v62 = vunpack.i.l.bf16 %v3638_v60 }
  0xd0   : > { %v4103_v50 = vld [vmem:[#allocation2 + $0x28] sm:$0xff] }
  0xd1   : > { %vm649_vm7 = vcmp.ge.f32.partialorder %v4103_v50, 0.0  ;;  %v655_v51 = vmul.f32 0.2, %v4103_v50  ;;  %v686_v58 = vsel %vm683_vm3, %v3634_v57, %v3635_v56  ;;  %v812_v0 = vsel %vm810_vm12, %v3639_v62, %v3640_v61 }
  0xd2   : > { %753 = vmatpush.msra.mxu2 %v686_v58 }
  0xd3   : > { %v661_v53 = vsel %vm649_vm7, %v4103_v50, %v655_v51  ;;  %vm694_vm7 = vcmask 64512  }
  0xd4   : > { %v3661_v54 = vpack.i.bf16 %v661_v53, %v660_v52  ;;  %3433 = vmatmul.msk.f32.vlgmr.msra.gmra.mxu2 %vm694_vm7, %v3430_v59 }
  0xd5   : > { %859 = vmatpush.msrb.mxu2 %v812_v0 }
  0xd6   : > { %3662 = vrot.lane.b32.xlu1 %v3661_v54, %s3901_s8  ;;  %3657 = vrot.lane.b32.xlu0 %v3661_v54, %s3908_s17 }
  0xd7   : > { %3652 = vrot.lane.b32.xlu2 %v3661_v54, %s3900_s29 }
  0xdc   : > { %3437 = vmatmul.msk.f32.vlgmr.msrb.gmra.mxu2 %vm694_vm7, %v4124_v63 }
  0xde   : > { %3667 = vrot.lane.b32.xlu0 %v4071_v17, %s3900_s29  ;;  %1060 = vperm.xlu1 %3671, %v1057_v9  }
  0xdf   : > { %804 = vrot.lane.b32.xlu2 %v4068_v16, %s3901_s8  ;;  %s3911_s8 = smov 7  }
 0x117   : > { %v3643_v1 = vpop.permute.xlu2 %3642 }
 0x118   : > { %v3645_v3 = vunpack.i.h.bf16 %v3643_v1  ;;  %v3644_v4 = vunpack.i.l.bf16 %v3643_v1 }
 0x11a   : > { %v684_v6 = vsel %vm683_vm3, %v3645_v3, %v3644_v4  ;;  %v685_v7 = vsel %vm683_vm3, %v3644_v4, %v3634_v57 }
 0x11b   : > { %713 = vmatpush.msra.mxu0 %v684_v6  ;;  %733 = vmatpush.msra.mxu1 %v685_v7 }
 0x11c   : > { %3432 = vmatmul.msk.f32.vlgmr.msra.gmra.mxu1 %vm694_vm7, %v3430_v59  ;;  %3431 = vmatmul.msk.f32.vlgmr.msra.gmra.mxu0 %vm694_vm7, %v3430_v59 }
 0x12d   : > { %v799_v10 = vpop.permute.xlu1 %798 }
 0x12e   : > { %v811_v13 = vsel %vm810_vm12, %v799_v10, %v3639_v62 }
 0x12f   : > { %v3648_v14 = vpop.permute.xlu0 %3647  ;;  %839 = vmatpush.msrb.mxu1 %v811_v13 }
 0x130   : > { %v3650_v15 = vunpack.i.h.bf16 %v3648_v14  ;;  %v3649_v16 = vunpack.i.l.bf16 %v3648_v14  ;;  %3436 = vmatmul.msk.f32.vlgmr.msrb.gmra.mxu1 %vm694_vm7, %v4124_v63 }
 0x131   : > { %v3653_v17 = vpop.permute.xlu2 %3652 }
 0x132   : > { %v3655_v19 = vunpack.i.h.bf16 %v3653_v17  ;;  %v3654_v20 = vunpack.i.l.bf16 %v3653_v17  ;;  %v939_v21 = vsel %vm938_vm4, %v3649_v16, %v3650_v15 }
 0x133   : > { %967 = vmatpush.msra.mxu2 %v939_v21 }
 0x134   : > { %3442 = vmatmul.msk.f32.vlgmr.msra.gmra.mxu2 %vm694_vm7, %v3441_v18  ;;  %v943_v22 = vsel %vm938_vm4, %v3654_v20, %v3655_v19 }
 0x135   : > { %1047 = vmatpush.msrb.mxu2 %v943_v22  ;;  %v1460_v22 = vld [vmem:[%s4585_s6] sm:$0xff] }
 0x139   : > { %v805_v29 = vpop.permute.xlu2 %804 }
 0x13a   : > { %v813_v34 = vsel %vm810_vm12, %v3640_v61, %v805_v29 }
 0x13c   : > { %3446 = vmatmul.msk.f32.vlgmr.msrb.gmra.mxu2 %vm694_vm7, %v3441_v18 }
 0x148   : > { %v3663_v23 = vpop.permute.xlu1 %3662  ;;  %v3658_v24 = vpop.permute.xlu0 %3657 }
 0x149   : > { %v3665_v25 = vunpack.i.h.bf16 %v3663_v23  ;;  %v3664_v26 = vunpack.i.l.bf16 %v3663_v23  ;;  %v3660_v27 = vunpack.i.h.bf16 %v3658_v24  ;;  %v3659_v28 = vunpack.i.l.bf16 %v3658_v24 }
 0x14b   : > { %v687_v30 = vsel %vm683_vm3, %v3635_v56, %v3659_v28  ;;  %v688_v31 = vsel %vm683_vm3, %v3659_v28, %v3660_v27  ;;  %v815_v32 = vsel %vm810_vm12, %v3664_v26, %v3665_v25  ;;  %v814_v33 = vsel %vm810_vm12, %v805_v29, %v3664_v26  ;;  %v3447_v29 = vld [vmem:[%s4584_s5 + $0x8] sm:$0xff] }
 0x14c   : > { %773 = vmatpush.msra.mxu3 %v687_v30  ;;  %793 = vmatpush.msrb.mxu0 %v688_v31  ;;  %vm1072_vm3 = vcmask 179200   ;;  %v1091_v30 = vld [vmem:[%s4584_s5] sm:$0xff]  ;;  %vm1509_vm12 = vcmask 1048496  }
 0x14d   : > { %919 = vmatpush.msra.mxu1 %v815_v32  ;;  %3434 = vmatmul.msk.f32.vlgmr.msra.gmra.mxu3 %vm694_vm7, %v3430_v59 }
 0x14e   : > { %3435 = vmatmul.msk.f32.vlgmr.msrb.gmra.mxu0 %vm694_vm7, %v3430_v59  ;;  %879 = vmatpush.msrb.mxu3 %v813_v34 }
 0x14f   : > { %899 = vmatpush.msra.mxu0 %v814_v33  ;;  %3440 = vmatmul.msk.f32.vlgmr.msra.gmra.mxu1 %vm694_vm7, %v4124_v63 }
 0x150   : > { %v3668_v35 = vpop.permute.xlu0 %3667  ;;  %v1061_v51 = vpop.permute.xlu1 %1060 }
 0x151   : > { %v3670_v36 = vunpack.i.h.bf16 %v3668_v35  ;;  %v3669_v37 = vunpack.i.l.bf16 %v3668_v35 }
 0x153   : > { %v940_v39 = vsel %vm938_vm4, %v3650_v15, %v3669_v37  ;;  %v942_v40 = vsel %vm938_vm4, %v3670_v36, %v3654_v20  ;;  %v941_v41 = vsel %vm938_vm4, %v3669_v37, %v3670_v36 }
 0x154   : > { %987 = vmatpush.msra.mxu3 %v940_v39  ;;  %1027 = vmatpush.msrb.mxu1 %v942_v40 }
 0x155   : > { %3438 = vmatmul.msk.f32.vlgmr.msrb.gmra.mxu3 %vm694_vm7, %v4124_v63  ;;  %1007 = vmatpush.msrb.mxu0 %v941_v41  ;;  %v3458_v41 = vld [vmem:[%s4584_s5 + $0x10] sm:$0xff] }
 0x156   : > { %3439 = vmatmul.msk.f32.vlgmr.msra.gmra.mxu0 %vm694_vm7, %v4124_v63 }
 0x157   : > { %3445 = vmatmul.msk.f32.vlgmr.msrb.gmra.mxu1 %vm694_vm7, %v3441_v18  ;;  %v755_v42 = vpop.f32.mrf.mxu2 }
 0x15d   : > { %3443 = vmatmul.msk.f32.vlgmr.msra.gmra.mxu3 %vm694_vm7, %v3441_v18 }
 0x15e   : > { %3444 = vmatmul.msk.f32.vlgmr.msrb.gmra.mxu0 %vm694_vm7, %v3441_v18 }
 0x15f   : > { %v861_v44 = vpop.f32.mrf.mxu2 }
 0x199   : > { %v735_v43 = vpop.f32.mrf.mxu1  ;;  %v715_v46 = vpop.f32.mrf.mxu0 }
 0x19a   : > { %v862_v45 = vadd.f32 %v861_v44, %v735_v43 }
 0x1ad   : > { %v841_v47 = vpop.f32.mrf.mxu1 }
 0x1ae   : > { %v842_v48 = vadd.f32 %v841_v47, %v715_v46 }
 0x1b7   : > { %v969_v49 = vpop.f32.mrf.mxu2 }
 0x1b8   : > { %v1052_v52 = vadd.f32 %v969_v49, %v842_v48 }
 0x1ba   : > { %v1063_v53 = vadd.f32 %v1061_v51, %v1052_v52 }
 0x1bc   : > { %1068 = vst [vmem:[#allocation3] sm:$0xff] %v1063_v53  ;;  %1079 = vrot.lane.b32.xlu0 %v1063_v53, %s3884_s18 }
 0x1bf   : > { %v1049_v56 = vpop.f32.mrf.mxu2 }
 0x1cb   : > { %v795_v54 = vpop.f32.mrf.mxu0 }
 0x1cc   : > { %v921_v55 = vpop.f32.mrf.mxu1 }
 0x1cd   : > { %v922_v57 = vadd.f32 %v921_v55, %v795_v54 }
 0x1cf   : > { %v1056_v58 = vadd.f32 %v1049_v56, %v922_v57 }
 0x1d0   : > { %v775_v59 = vpop.f32.mrf.mxu3 }
 0x1d1   : > { %v1067_v60 = vadd.f32 %v1061_v51, %v1056_v58 }
 0x1d3   : > { %1073 = vst.msk [vmem:[#allocation3 + $0x20] sm:$0xff] %vm1072_vm3, %v1067_v60  ;;  %v901_v61 = vpop.f32.mrf.mxu0  ;;  %vm1492_vm3 = vcmask 965632  }
 0x1d4   : > { %v902_v62 = vadd.f32 %v901_v61, %v775_v59  ;;  %v1029_v10 = vpop.f32.mrf.mxu1 }
 0x1d6   : > { %v1055_v17 = vadd.f32 %v1029_v10, %v902_v62 }
 0x1d8   : > { %v881_v63 = vpop.f32.mrf.mxu3  ;;  %v1066_v18 = vadd.f32 %v1061_v51, %v1055_v17 }
 0x1d9   : > { %v882_v0 = vadd.f32 %v881_v63, %v755_v42 }
 0x1da   : > { %v1084_v1 = vld [vmem:[#allocation3 + $0x20] sm:$0xff] }
 0x1db   : > { %1086 = vrot.lane.b32.xlu2 %v1084_v1, %s3893_s10  ;;  %v1009_v3 = vpop.f32.mrf.mxu0 }
 0x1dc   : > { %v1054_v4 = vadd.f32 %v1009_v3, %v882_v0 }
 0x1de   : > { %v1065_v6 = vadd.f32 %v1061_v51, %v1054_v4 }
 0x1e0   : > { %1108 = vrot.lane.b32.xlu0 %v1065_v6, %s3910_s22  ;;  %v989_v7 = vpop.f32.mrf.mxu3 }
 0x1e1   : > { %v1053_v9 = vadd.f32 %v989_v7, %v862_v45 }
 0x1e3   : > { %v1064_v13 = vadd.f32 %v1061_v51, %v1053_v9 }
 0x1e5   : > { %v3682_v21 = vpack.i.bf16 %v1065_v6, %v1064_v13 }
 0x22e   : > { %v1080_v8 = vpop.permute.xlu0 %1079 }
 0x22f   : > { %1083 = vst.msk [vmem:[#allocation3] sm:$0xff] %vm629_vm13, %v1080_v8  ;;  %vm1114_vm13 = vcmask 1039360  }
 0x235   : > { %v1087_v14 = vpop.permute.xlu2 %1086 }
 0x236   : > { %1090 = vst.msk [vmem:[#allocation3 + $0x20] sm:$0xff] %vm636_vm14, %v1087_v14  ;;  %v1092_v15 = vld [vmem:[#allocation3] sm:$0xff]  ;;  %vm1342_vm14 = vcmask 1031168  }
 0x237   : > { %v3677_v16 = vpack.i.bf16 %v1064_v13, %v1092_v15 }
 0x239   : > { %3678 = vrot.lane.b32.xlu2 %v3677_v16, %s3910_s22 }
 0x23d   : > { %v1096_v19 = vld [vmem:[#allocation3 + $0x20] sm:$0xff] }
 0x23e   : > { %v3672_v20 = vpack.i.bf16 %v1096_v19, %v1066_v18 }
 0x240   : > { %3673 = vrot.lane.b32.xlu1 %v3672_v20, %s3910_s22  ;;  %3688 = vrot.lane.b32.xlu0 %v3672_v20, %s3884_s18 }
 0x241   : > { %1332 = vrot.lane.b32.xlu2 %v1092_v15, %s3884_s18 }
 0x248   : > { %3683 = vrot.lane.b32.xlu1 %v3682_v21, %s3884_s18 }
 0x250   : > { %1463 = vperm.xlu1 %3671, %v1460_v22  }
 0x252   : > { %v1109_v26 = vpop.permute.xlu0 %1108 }
 0x293   : > { %v3679_v23 = vpop.permute.xlu2 %3678 }
 0x294   : > { %v3681_v24 = vunpack.i.h.bf16 %v3679_v23  ;;  %v3680_v25 = vunpack.i.l.bf16 %v3679_v23 }
 0x296   : > { %v1115_v27 = vsel %vm1114_vm13, %v3680_v25, %v3681_v24  ;;  %v1116_v28 = vsel %vm1114_vm13, %v3681_v24, %v1109_v26 }
 0x297   : > { %1142 = vmatpush.msrb.mxu3 %v1115_v27  ;;  %1162 = vmatpush.msra.mxu0 %v1116_v28 }
 0x298   : > { %3448 = vmatmul.msk.f32.vlgmr.msrb.gmra.mxu3 %vm694_vm7, %v3447_v29  ;;  %3449 = vmatmul.msk.f32.vlgmr.msra.gmra.mxu0 %vm694_vm7, %v3447_v29 }
 0x299   : > { %1245 = vmatpush.msrb.mxu0 %v1092_v15 }
 0x29b   : > { %1325 = vmatpush.msra.mxu0 %v1096_v19  ;;  %v1333_v45 = vpop.permute.xlu2 %1332 }
 0x2a0   : > { %3453 = vmatmul.msk.f32.vlgmr.msrb.gmra.mxu0 %vm694_vm7, %v1091_v30 }
 0x2a8   : > { %3457 = vmatmul.msk.f32.vlgmr.msra.gmra.mxu0 %vm694_vm7, %v1091_v30 }
 0x2b2   : > { %v3674_v31 = vpop.permute.xlu1 %3673  ;;  %v3689_v32 = vpop.permute.xlu0 %3688 }
 0x2b3   : > { %v3676_v33 = vunpack.i.h.bf16 %v3674_v31  ;;  %v3675_v34 = vunpack.i.l.bf16 %v3674_v31  ;;  %v3691_v35 = vunpack.i.h.bf16 %v3689_v32  ;;  %v3690_v36 = vunpack.i.l.bf16 %v3689_v32 }
 0x2b5   : > { %1222 = vmatpush.msra.mxu3 %v3676_v33  ;;  %v1117_v37 = vsel %vm1114_vm13, %v1109_v26, %v3675_v34  ;;  %v1118_v39 = vsel %vm1114_vm13, %v3675_v34, %v3676_v33  ;;  %v1346_v40 = vsel %vm1342_vm14, %v3690_v36, %v3691_v35 }
 0x2b6   : > { %1182 = vmatpush.msra.mxu1 %v1117_v37  ;;  %1202 = vmatpush.msra.mxu2 %v1118_v39 }
 0x2b7   : > { %3452 = vmatmul.msk.f32.vlgmr.msra.gmra.mxu3 %vm694_vm7, %v3447_v29  ;;  %1430 = vmatpush.msrb.mxu0 %v1346_v40 }
 0x2b8   : > { %1305 = vmatpush.msrb.mxu3 %v1066_v18  ;;  %3450 = vmatmul.msk.f32.vlgmr.msra.gmra.mxu1 %vm694_vm7, %v3447_v29 }
 0x2b9   : > { %3451 = vmatmul.msk.f32.vlgmr.msra.gmra.mxu2 %vm694_vm7, %v3447_v29  ;;  %1265 = vmatpush.msrb.mxu1 %v1064_v13 }
 0x2ba   : > { %1285 = vmatpush.msrb.mxu2 %v1065_v6  ;;  %v3684_v42 = vpop.permute.xlu1 %3683  ;;  %3462 = vmatmul.msk.f32.vlgmr.msrb.gmra.mxu0 %vm694_vm7, %v3458_v41 }
 0x2bb   : > { %v3686_v43 = vunpack.i.h.bf16 %v3684_v42  ;;  %v3685_v44 = vunpack.i.l.bf16 %v3684_v42 }
 0x2bd   : > { %v1343_v46 = vsel %vm1342_vm14, %v1333_v45, %v3685_v44  ;;  %v1344_v47 = vsel %vm1342_vm14, %v3685_v44, %v3686_v43  ;;  %v1345_v48 = vsel %vm1342_vm14, %v3686_v43, %v3690_v36 }
 0x2be   : > { %1370 = vmatpush.msra.mxu1 %v1343_v46  ;;  %1390 = vmatpush.msra.mxu2 %v1344_v47 }
 0x2bf   : > { %3456 = vmatmul.msk.f32.vlgmr.msrb.gmra.mxu3 %vm694_vm7, %v1091_v30 }
 0x2c0   : > { %1410 = vmatpush.msra.mxu3 %v1345_v48  ;;  %3454 = vmatmul.msk.f32.vlgmr.msrb.gmra.mxu1 %vm694_vm7, %v1091_v30 }
 0x2c1   : > { %3455 = vmatmul.msk.f32.vlgmr.msrb.gmra.mxu2 %vm694_vm7, %v1091_v30  ;;  %1450 = vmatpush.msrb.mxu1 %v3691_v35 }
 0x2c2   : > { %v1464_v1 = vpop.permute.xlu1 %1463 }
 0x2c7   : > { %3461 = vmatmul.msk.f32.vlgmr.msra.gmra.mxu3 %vm694_vm7, %v3458_v41 }
 0x2c8   : > { %3459 = vmatmul.msk.f32.vlgmr.msra.gmra.mxu1 %vm694_vm7, %v3458_v41 }
 0x2c9   : > { %3460 = vmatmul.msk.f32.vlgmr.msra.gmra.mxu2 %vm694_vm7, %v3458_v41 }
 0x2d0   : > { %3463 = vmatmul.msk.f32.vlgmr.msrb.gmra.mxu1 %vm694_vm7, %v3458_v41 }
 0x315   : > { %v1164_v49 = vpop.f32.mrf.mxu0 }
 0x31b   : > { %v1144_v52 = vpop.f32.mrf.mxu3 }
 0x31d   : > { %v1247_v51 = vpop.f32.mrf.mxu0 }
 0x31e   : > { %v1248_v58 = vadd.f32 %v1247_v51, %v1144_v52 }
 0x325   : > { %v1327_v54 = vpop.f32.mrf.mxu0 }
 0x335   : > { %v1184_v53 = vpop.f32.mrf.mxu1 }
 0x337   : > { %v1432_v60 = vpop.f32.mrf.mxu0 }
 0x33a   : > { %v1224_v55 = vpop.f32.mrf.mxu3 }
 0x33b   : > { %v1328_v7 = vadd.f32 %v1327_v54, %v1224_v55 }
 0x33c   : > { %v1204_v56 = vpop.f32.mrf.mxu2 }
 0x33d   : > { %v1267_v57 = vpop.f32.mrf.mxu1 }
 0x33e   : > { %v1268_v8 = vadd.f32 %v1267_v57, %v1164_v49 }
 0x342   : > { %v1307_v59 = vpop.f32.mrf.mxu3 }
 0x343   : > { %v1308_v61 = vadd.f32 %v1307_v59, %v1204_v56 }
 0x344   : > { %v1287_v62 = vpop.f32.mrf.mxu2 }
 0x345   : > { %v1458_v63 = vadd.f32 %v1432_v60, %v1308_v61  ;;  %v1372_v0 = vpop.f32.mrf.mxu1  ;;  %v1288_v18 = vadd.f32 %v1287_v62, %v1184_v53  ;;  %v3465_v62 = vld [vmem:[%s4582_s3 + $0x20] sm:$0xff] }
 0x346   : > { %v1455_v3 = vadd.f32 %v1372_v0, %v1248_v58 }
 0x347   : > { %v1469_v4 = vadd.f32 %v1464_v1, %v1458_v63 }
 0x348   : > { %v1466_v6 = vadd.f32 %v1464_v1, %v1455_v3 }
 0x349   : > { %1488 = vrot.lane.b32.xlu1 %v1469_v4, %s3886_s20 }
 0x34a   : > { %1482 = vrot.lane.b32.xlu2 %v1466_v6, %s3886_s20  ;;  %v1412_v16 = vpop.f32.mrf.mxu3 }
 0x34b   : > { %v1457_v19 = vadd.f32 %v1412_v16, %v1288_v18 }
 0x34c   : > { %v1392_v9 = vpop.f32.mrf.mxu2 }
 0x34d   : > { %v1456_v10 = vadd.f32 %v1392_v9, %v1268_v8  ;;  %v1452_v13 = vpop.f32.mrf.mxu1  ;;  %v1468_v20 = vadd.f32 %v1464_v1, %v1457_v19 }
 0x34e   : > { %v1459_v14 = vadd.f32 %v1452_v13, %v1328_v7 }
 0x34f   : > { %v1467_v15 = vadd.f32 %v1464_v1, %v1456_v10 }
 0x350   : > { %v1470_v17 = vadd.f32 %v1464_v1, %v1459_v14  ;;  %v3482_v14 = vld [vmem:[%s4583_s4 + $0x8] sm:$0xff] }
 0x351   : > { %1484 = vrot.lane.b32.xlu0 %v1467_v15, %s3886_s20 }
 0x352   : > { %1490 = vrot.lane.b32.xlu2 %v1470_v17, %s3886_s20 }
 0x359   : > { %1486 = vrot.lane.b32.xlu0 %v1468_v20, %s3886_s20 }
 0x3a4   : > { %v1483_v21 = vpop.permute.xlu2 %1482 }
 0x3a5   : > { %v1503_v22 = vadd.f32 %v1483_v21, %v4088_v38 }
 0x3a7   : > { %1510 = vst.msk [vmem:[#allocation2] sm:$0xff] %vm1509_vm12, %v1503_v22 }
 0x3ac   : > { %v1491_v23 = vpop.permute.xlu2 %1490 }
 0x3ad   : > { %v1508_v24 = vadd.f32 %v1491_v23, %v4103_v50 }
 0x3af   : > { %1515 = vst.msk [vmem:[#allocation2 + $0x28] sm:$0xff] %vm938_vm4, %v1508_v24 }
 0x3bb   : > { %v1489_v28 = vpop.permute.xlu1 %1488 }
 0x3bc   : > { %v1496_v38 = vsel %vm1492_vm3, %v1489_v28, %v1491_v23 }
 0x3bd   : > { %v4231_v30 = vadd.f32 %v1496_v38, %v4033_v5 }
 0x3bf   : > { %v1577_v34 = vmul.f32 0.2, %v4231_v30  ;;  %vm1571_vm10 = vcmp.ge.f32.partialorder %v4231_v30, 0.0 }
 0x3c1   : > { %v1583_v35 = vsel %vm1571_vm10, %v4231_v30, %v1577_v34 }
 0x3c3   : > { %v1485_v25 = vpop.permute.xlu0 %1484 }
 0x3c4   : > { %v1493_v26 = vsel %vm1492_vm3, %v1483_v21, %v1485_v25 }
 0x3c5   : > { %v4220_v27 = vadd.f32 %v1493_v26, %v4016_v2 }
 0x3c7   : > { %1528 = vrot.lane.b32.xlu2 %v4220_v27, %s3887_s21  ;;  %1521 = vrot.lane.b32.xlu1 %v4220_v27, %s3884_s18  ;;  %v1574_v32 = vmul.f32 0.2, %v4220_v27  ;;  %vm1568_vm11 = vcmp.ge.f32.partialorder %v4220_v27, 0.0 }
 0x3c8   : > { %1535 = vrot.lane.b32.xlu0 %v4220_v27, %s3885_s19 }
 0x3cb   : > { %v1487_v50 = vpop.permute.xlu0 %1486 }
 0x3cc   : > { %v1494_v29 = vsel %vm1492_vm3, %v1485_v25, %v1487_v50  ;;  %v1495_v41 = vsel %vm1492_vm3, %v1487_v50, %v1489_v28  ;;  %vm1607_vm3 = vcmask 56320   ;;  %v3464_v25 = vld [vmem:[%s4582_s3 + $0x18] sm:$0xff] }
 0x3cd   : > { %v4234_v2 = vadd.f32 %v1494_v29, %v4058_v11  ;;  %v1580_v11 = vsel %vm1568_vm11, %v4220_v27, %v1574_v32  ;;  %v4258_v42 = vadd.f32 %v1495_v41, %v4060_v12 }
 0x3cf   : > { %1549 = vrot.lane.b32.xlu2 %v4231_v30, %s3895_s14  ;;  %1542 = vrot.lane.b32.xlu1 %v4231_v30, %s3893_s10  ;;  %vm1569_vm12 = vcmp.ge.f32.partialorder %v4234_v2, 0.0  ;;  %v1575_v31 = vmul.f32 0.2, %v4234_v2  ;;  %v1576_v45 = vmul.f32 0.2, %v4258_v42  ;;  %vm1570_vm10 = vcmp.ge.f32.partialorder %v4258_v42, 0.0 }
 0x3d0   : > { %1556 = vrot.lane.b32.xlu0 %v4231_v30, %s4597_s28 }
 0x3d1   : > { %v1581_v5 = vsel %vm1569_vm12, %v4234_v2, %v1575_v31  ;;  %v1582_v49 = vsel %vm1570_vm10, %v4258_v42, %v1576_v45  ;;  %vm1860_vm10 = vcmask 31744  }
 0x3d2   : > { %v3692_v33 = vpack.i.bf16 %v1581_v5, %v1580_v11  ;;  %v3702_v36 = vpack.i.bf16 %v1583_v35, %v1581_v5  ;;  %v3727_v60 = vpack.i.bf16 %v1582_v49, %v1581_v5 }
 0x3d7   : > { %3693 = vrot.lane.b32.xlu1 %v3692_v33, %s3911_s8  ;;  %v3476_v33 = vld [vmem:[%s4582_s3 + $0x28] sm:$0xff] }
 0x3df   : > { %3703 = vrot.lane.b32.xlu1 %v3702_v36, %s3900_s29 }
 0x421   : > { %v1529_v37 = vpop.permute.xlu2 %1528 }
 0x429   : > { %v1550_v44 = vpop.permute.xlu2 %1549 }
 0x439   : > { %v1522_v39 = vpop.permute.xlu1 %1521 }
 0x43a   : > { %1525 = vst.msk [vmem:[#allocation2] sm:$0xff] %vm475_vm6, %v1522_v39  ;;  %v1536_v40 = vpop.permute.xlu0 %1535 }
 0x43b   : > { %1532 = vst.msk [vmem:[#allocation2] sm:$0xff] %vm482_vm8, %v1529_v37 }
 0x43c   : > { %1539 = vst.msk [vmem:[#allocation2] sm:$0xff] %vm489_vm9, %v1536_v40 }
 0x441   : > { %v1543_v43 = vpop.permute.xlu1 %1542 }
 0x442   : > { %1546 = vst.msk [vmem:[#allocation2 + $0x28] sm:$0xff] %vm559_vm0, %v1543_v43  ;;  %v1557_v46 = vpop.permute.xlu0 %1556 }
 0x443   : > { %1553 = vst.msk [vmem:[#allocation2 + $0x28] sm:$0xff] %vm566_vm1, %v1550_v44  ;;  %v4263_v47 = vld [vmem:[#allocation2] sm:$0xff] }
 0x444   : > { %1560 = vst.msk [vmem:[#allocation2 + $0x28] sm:$0xff] %vm573_vm5, %v1557_v46  ;;  %vm1567_vm11 = vcmp.ge.f32.partialorder %v4263_v47, 0.0  ;;  %v1573_v12 = vmul.f32 0.2, %v4263_v47 }
 0x446   : > { %v1579_v48 = vsel %vm1567_vm11, %v4263_v47, %v1573_v12  ;;  %vm2438_vm11 = vcmask 48128  }
 0x447   : > { %v3717_v51 = vpack.i.bf16 %v1580_v11, %v1579_v48  ;;  %v3697_v52 = vpack.i.bf16 %v1579_v48, %v1582_v49 }
 0x449   : > { %v3694_v53 = vpop.permute.xlu1 %3693  ;;  %3718 = vrot.lane.b32.xlu1 %v3717_v51, %s3895_s14  ;;  %3713 = vrot.lane.b32.xlu0 %v3717_v51, %s3900_s29 }
 0x44a   : > { %v3696_v54 = vunpack.i.h.bf16 %v3694_v53  ;;  %v3695_v55 = vunpack.i.l.bf16 %v3694_v53  ;;  %3698 = vrot.lane.b32.xlu2 %v3697_v52, %s3911_s8 }
 0x44b   : > { %v4274_v56 = vld [vmem:[#allocation2 + $0x28] sm:$0xff] }
 0x44c   : > { %v1609_v57 = vsel %vm1607_vm3, %v3695_v55, %v3696_v54  ;;  %vm1572_vm12 = vcmp.ge.f32.partialorder %v4274_v56, 0.0  ;;  %v1578_v58 = vmul.f32 0.2, %v4274_v56 }
 0x44d   : > { %1656 = vmatpush.msrb.mxu3 %v1609_v57 }
 0x44e   : > { %v1584_v59 = vsel %vm1572_vm12, %v4274_v56, %v1578_v58  ;;  %3467 = vmatmul.msk.f32.vlgmr.msrb.gmra.mxu3 %vm694_vm7, %v3465_v62 }
 0x44f   : > { %v3707_v61 = vpack.i.bf16 %v1584_v59, %v1583_v35 }
 0x451   : > { %3728 = vrot.lane.b32.xlu1 %v3727_v60, %s3895_s14  ;;  %1731 = vrot.lane.b32.xlu0 %v1584_v59, %s3900_s29  ;;  %v3704_v13 = vpop.permute.xlu1 %3703 }
 0x452   : > { %3708 = vrot.lane.b32.xlu2 %v3707_v61, %s3911_s8  ;;  %v3705_v16 = vunpack.i.l.bf16 %v3704_v13  ;;  %v3706_v29 = vunpack.i.h.bf16 %v3704_v13  ;;  %s380_s8 = sand.u32 1, %s3866_s2  }
 0x459   : > { %1727 = vrot.lane.b32.xlu0 %v1582_v49, %s3900_s29 }
 0x45a   : > { %3723 = vrot.lane.b32.xlu2 %v3707_v61, %s3895_s14 }
 0x462   : > { %1983 = vperm.xlu2 %3732, %v3482_v14  }
 0x4a4   : > { %v3699_v63 = vpop.permute.xlu2 %3698 }
 0x4a5   : > { %v3701_v0 = vunpack.i.h.bf16 %v3699_v63  ;;  %v3700_v1 = vunpack.i.l.bf16 %v3699_v63 }
 0x4a7   : > { %v1608_v3 = vsel %vm1607_vm3, %v3701_v0, %v3695_v55  ;;  %v1610_v4 = vsel %vm1607_vm3, %v3696_v54, %v3700_v1 }
 0x4a8   : > { %1636 = vmatpush.msrb.mxu2 %v1608_v3  ;;  %1676 = vmatpush.msra.mxu0 %v1610_v4 }
 0x4a9   : > { %3468 = vmatmul.msk.f32.vlgmr.msra.gmra.mxu0 %vm694_vm7, %v3465_v62  ;;  %3466 = vmatmul.msk.f32.vlgmr.msrb.gmra.mxu2 %vm694_vm7, %v3465_v62 }
 0x4ac   : > { %v3709_v6 = vpop.permute.xlu2 %3708 }
 0x4ad   : > { %v3711_v7 = vunpack.i.h.bf16 %v3709_v6  ;;  %v3710_v8 = vunpack.i.l.bf16 %v3709_v6 }
 0x4af   : > { %v1611_v9 = vsel %vm1607_vm3, %v3700_v1, %v3710_v8  ;;  %v1612_v10 = vsel %vm1607_vm3, %v3710_v8, %v3711_v7 }
 0x4b0   : > { %1696 = vmatpush.msra.mxu1 %v1611_v9  ;;  %1716 = vmatpush.msra.mxu2 %v1612_v10 }
 0x4b1   : > { %3469 = vmatmul.msk.f32.vlgmr.msra.gmra.mxu1 %vm694_vm7, %v3465_v62  ;;  %3470 = vmatmul.msk.f32.vlgmr.msra.gmra.mxu2 %vm694_vm7, %v3465_v62 }
 0x4b4   : > { %v3724_v15 = vpop.permute.xlu2 %3723 }
 0x4b5   : > { %v3726_v23 = vunpack.i.h.bf16 %v3724_v15  ;;  %v3725_v24 = vunpack.i.l.bf16 %v3724_v15 }
 0x4b7   : > { %v1865_v50 = vsel %vm1860_vm10, %v3725_v24, %v3726_v23 }
 0x4bb   : > { %v3719_v17 = vpop.permute.xlu1 %3718  ;;  %v3714_v18 = vpop.permute.xlu0 %3713 }
 0x4bc   : > { %v3721_v19 = vunpack.i.h.bf16 %v3719_v17  ;;  %v3720_v20 = vunpack.i.l.bf16 %v3719_v17  ;;  %v3716_v21 = vunpack.i.h.bf16 %v3714_v18  ;;  %v3715_v22 = vunpack.i.l.bf16 %v3714_v18  ;;  %v1984_v52 = vpop.permute.xlu2 %1983 }
 0x4be   : > { %v1733_v26 = vsel %vm938_vm4, %v3715_v22, %v3716_v21  ;;  %v1734_v28 = vsel %vm938_vm4, %v3716_v21, %v3705_v16  ;;  %v1861_v38 = vsel %vm1860_vm10, %v3720_v20, %v3721_v19  ;;  %v3484_v22 = vld [vmem:[%s4584_s5 + $0x20] sm:$0xff] }
 0x4bf   : > { %1761 = vmatpush.msra.mxu3 %v1733_v26  ;;  %1781 = vmatpush.msrb.mxu0 %v1734_v28 }
 0x4c0   : > { %3471 = vmatmul.msk.f32.vlgmr.msra.gmra.mxu3 %vm694_vm7, %v3464_v25  ;;  %3472 = vmatmul.msk.f32.vlgmr.msrb.gmra.mxu0 %vm694_vm7, %v3464_v25 }
 0x4c1   : > { %1889 = vmatpush.msra.mxu0 %v1861_v38 }
 0x4c3   : > { %1969 = vmatpush.msrb.mxu0 %v1865_v50  ;;  %v3729_v31 = vpop.permute.xlu1 %3728  ;;  %v1732_v32 = vpop.permute.xlu0 %1731 }
 0x4c4   : > { %v3731_v5 = vunpack.i.h.bf16 %v3729_v31  ;;  %v1737_v11 = vsel %vm938_vm4, %v3706_v29, %v1732_v32  ;;  %v3730_v35 = vunpack.i.l.bf16 %v3729_v31  ;;  %v3483_v31 = vld [vmem:[%s4584_s5 + $0x18] sm:$0xff] }
 0x4c5   : > { %1841 = vmatpush.msrb.mxu3 %v1737_v11  ;;  %v3501_v11 = vld [vmem:[%s4585_s6 + $0x8] sm:$0xff] }
 0x4c6   : > { %v1864_v34 = vsel %vm1860_vm10, %v3731_v5, %v3725_v24  ;;  %v1862_v40 = vsel %vm1860_vm10, %v3721_v19, %v3730_v35  ;;  %v1863_v41 = vsel %vm1860_vm10, %v3730_v35, %v3731_v5 }
 0x4c7   : > { %1949 = vmatpush.msra.mxu3 %v1864_v34 }
 0x4c8   : > { %3475 = vmatmul.msk.f32.vlgmr.msrb.gmra.mxu3 %vm694_vm7, %v3464_v25  ;;  %3477 = vmatmul.msk.f32.vlgmr.msra.gmra.mxu0 %vm694_vm7, %v3476_v33 }
 0x4cb   : > { %v1728_v36 = vpop.permute.xlu0 %1727 }
 0x4cc   : > { %v1735_v37 = vsel %vm938_vm4, %v3705_v16, %v1728_v36  ;;  %v1736_v39 = vsel %vm938_vm4, %v1728_v36, %v3706_v29  ;;  %vm1995_vm4 = vcmask 113664   ;;  %v3495_v36 = vld [vmem:[%s4584_s5 + $0x28] sm:$0xff] }
 0x4cd   : > { %1801 = vmatpush.msrb.mxu1 %v1735_v37  ;;  %1821 = vmatpush.msrb.mxu2 %v1736_v39 }
 0x4ce   : > { %3473 = vmatmul.msk.f32.vlgmr.msrb.gmra.mxu1 %vm694_vm7, %v3464_v25  ;;  %3474 = vmatmul.msk.f32.vlgmr.msrb.gmra.mxu2 %vm694_vm7, %v3464_v25 }
 0x4cf   : > { %1909 = vmatpush.msra.mxu1 %v1862_v40  ;;  %1929 = vmatpush.msra.mxu2 %v1863_v41 }
 0x4d0   : > { %3480 = vmatmul.msk.f32.vlgmr.msra.gmra.mxu3 %vm694_vm7, %v3476_v33  ;;  %3481 = vmatmul.msk.f32.vlgmr.msrb.gmra.mxu0 %vm694_vm7, %v3476_v33 }
 0x4d1   : > { %v1658_v44 = vpop.f32.mrf.mxu3 }
 0x4d6   : > { %3478 = vmatmul.msk.f32.vlgmr.msra.gmra.mxu1 %vm694_vm7, %v3476_v33  ;;  %3479 = vmatmul.msk.f32.vlgmr.msra.gmra.mxu2 %vm694_vm7, %v3476_v33 }
 0x526   : > { %v1678_v43 = vpop.f32.mrf.mxu0 }
 0x52c   : > { %v1638_v46 = vpop.f32.mrf.mxu2 }
 0x52e   : > { %v1698_v12 = vpop.f32.mrf.mxu1 }
 0x534   : > { %v1718_v54 = vpop.f32.mrf.mxu2 }
 0x53d   : > { %v1783_v45 = vpop.f32.mrf.mxu0 }
 0x53e   : > { %v1784_v1 = vadd.f32 %v1783_v45, %v1658_v44 }
 0x543   : > { %v1763_v48 = vpop.f32.mrf.mxu3 }
 0x544   : > { %v1764_v49 = vadd.f32 %v1763_v48, %v1638_v46 }
 0x545   : > { %v1891_v51 = vpop.f32.mrf.mxu0 }
 0x546   : > { %v1974_v53 = vadd.f32 %v1891_v51, %v1764_v49 }
 0x548   : > { %v1986_v55 = vadd.f32 %v1984_v52, %v1974_v53 }
 0x54a   : > { %1991 = vst [vmem:[#allocation3] sm:$0xff] %v1986_v55  ;;  %2002 = vrot.lane.b32.xlu1 %v1986_v55, %s3884_s18 }
 0x54b   : > { %v1803_v57 = vpop.f32.mrf.mxu1  ;;  %v1843_v58 = vpop.f32.mrf.mxu3 }
 0x54c   : > { %v1844_v59 = vadd.f32 %v1843_v58, %v1718_v54  ;;  %v1804_v3 = vadd.f32 %v1803_v57, %v1678_v43 }
 0x54d   : > { %v1971_v60 = vpop.f32.mrf.mxu0 }
 0x54e   : > { %v1978_v61 = vadd.f32 %v1971_v60, %v1844_v59 }
 0x550   : > { %v1990_v62 = vadd.f32 %v1984_v52, %v1978_v61 }
 0x551   : > { %v1823_v63 = vpop.f32.mrf.mxu2 }
 0x552   : > { %1996 = vst.msk [vmem:[#allocation3 + $0x20] sm:$0xff] %vm1995_vm4, %v1990_v62  ;;  %v1824_v4 = vadd.f32 %v1823_v63, %v1698_v12 }
 0x553   : > { %v1911_v0 = vpop.f32.mrf.mxu1  ;;  %v1951_v7 = vpop.f32.mrf.mxu3 }
 0x554   : > { %v1975_v6 = vadd.f32 %v1911_v0, %v1784_v1  ;;  %v1977_v14 = vadd.f32 %v1951_v7, %v1824_v4 }
 0x556   : > { %v1987_v13 = vadd.f32 %v1984_v52, %v1975_v6  ;;  %v1989_v17 = vadd.f32 %v1984_v52, %v1977_v14 }
 0x559   : > { %v1931_v8 = vpop.f32.mrf.mxu2  ;;  %v2007_v9 = vld [vmem:[#allocation3 + $0x20] sm:$0xff] }
 0x55a   : > { %v1976_v10 = vadd.f32 %v1931_v8, %v1804_v3  ;;  %2009 = vrot.lane.b32.xlu0 %v2007_v9, %s3893_s10 }
 0x55c   : > { %v1988_v15 = vadd.f32 %v1984_v52, %v1976_v10 }
 0x55e   : > { %v3733_v16 = vpack.i.bf16 %v1988_v15, %v1987_v13  ;;  %v3743_v29 = vpack.i.bf16 %v1989_v17, %v1988_v15 }
 0x560   : > { %3734 = vrot.lane.b32.xlu2 %v3733_v16, %s3910_s22 }
 0x562   : > { %2034 = vrot.lane.b32.xlu0 %v1989_v17, %s3910_s22 }
 0x5ba   : > { %v3735_v18 = vpop.permute.xlu2 %3734 }
 0x5bb   : > { %v3737_v19 = vunpack.i.h.bf16 %v3735_v18  ;;  %v3736_v20 = vunpack.i.l.bf16 %v3735_v18 }
 0x5bc   : > { %v2003_v21 = vpop.permute.xlu1 %2002 }
 0x5bd   : > { %2006 = vst.msk [vmem:[#allocation3] sm:$0xff] %vm601_vm15, %v2003_v21  ;;  %v2039_v23 = vsel %vm1114_vm13, %v3736_v20, %v3737_v19  ;;  %vm2415_vm15 = vcmask 998400  }
 0x5be   : > { %2085 = vmatpush.msrb.mxu2 %v2039_v23 }
 0x5bf   : > { %3486 = vmatmul.msk.f32.vlgmr.msrb.gmra.mxu2 %vm694_vm7, %v3484_v22 }
 0x5c4   : > { %v2016_v24 = vld [vmem:[#allocation3] sm:$0xff] }
 0x5c5   : > { %2028 = vrot.lane.b32.xlu2 %v2016_v24, %s3910_s22  ;;  %2168 = vmatpush.msra.mxu2 %v2016_v24  ;;  %v3738_v25 = vpack.i.bf16 %v1987_v13, %v2016_v24 }
 0x5c7   : > { %3739 = vrot.lane.b32.xlu0 %v3738_v25, %s3884_s18  ;;  %3490 = vmatmul.msk.f32.vlgmr.msra.gmra.mxu2 %vm694_vm7, %v3483_v31 }
 0x5cc   : > { %v2010_v26 = vpop.permute.xlu0 %2009 }
 0x5cd   : > { %2013 = vst.msk [vmem:[#allocation3 + $0x20] sm:$0xff] %vm608_vm2, %v2010_v26  ;;  %vm2432_vm2 = vcmask 1048528  }
 0x5cf   : > { %2386 = vperm.xlu0 %3748, %v3501_v11  }
 0x5d4   : > { %v2035_v28 = vpop.permute.xlu0 %2034  ;;  %v2020_v38 = vld [vmem:[#allocation3 + $0x20] sm:$0xff] }
 0x5d5   : > { %v2040_v50 = vsel %vm1114_vm13, %v3737_v19, %v2035_v28  ;;  %2036 = vrot.lane.b32.xlu1 %v2020_v38, %s3910_s22  ;;  %2263 = vrot.lane.b32.xlu2 %v2020_v38, %s3884_s18 }
 0x5d6   : > { %2248 = vmatpush.msrb.mxu2 %v2020_v38  ;;  %2105 = vmatpush.msrb.mxu3 %v2040_v50 }
 0x5d7   : > { %3487 = vmatmul.msk.f32.vlgmr.msrb.gmra.mxu3 %vm694_vm7, %v3484_v22  ;;  %3494 = vmatmul.msk.f32.vlgmr.msrb.gmra.mxu2 %vm694_vm7, %v3483_v31 }
 0x5d8   : > { %2188 = vmatpush.msra.mxu3 %v1987_v13 }
 0x5dd   : > { %3744 = vrot.lane.b32.xlu1 %v3743_v29, %s3884_s18 }
 0x5df   : > { %3491 = vmatmul.msk.f32.vlgmr.msra.gmra.mxu3 %vm694_vm7, %v3483_v31 }
 0x61f   : > { %v2029_v32 = vpop.permute.xlu2 %2028 }
 0x620   : > { %v2038_v5 = vsel %vm1114_vm13, %v2029_v32, %v3736_v20 }
 0x621   : > { %2065 = vmatpush.msrb.mxu1 %v2038_v5 }
 0x622   : > { %3485 = vmatmul.msk.f32.vlgmr.msrb.gmra.mxu1 %vm694_vm7, %v3484_v22 }
 0x62f   : > { %v2264_v39 = vpop.permute.xlu2 %2263 }
 0x639   : > { %v3740_v33 = vpop.permute.xlu0 %3739 }
 0x63a   : > { %v3742_v34 = vunpack.i.h.bf16 %v3740_v33  ;;  %v3741_v35 = vunpack.i.l.bf16 %v3740_v33 }
 0x63c   : > { %v2265_v37 = vsel %vm1342_vm14, %v3741_v35, %v3742_v34 }
 0x63d   : > { %2292 = vmatpush.msrb.mxu3 %v2265_v37 }
 0x63e   : > { %3496 = vmatmul.msk.f32.vlgmr.msrb.gmra.mxu3 %vm694_vm7, %v3495_v36 }
 0x63f   : > { %2372 = vmatpush.msra.mxu3 %v2264_v39 }
 0x641   : > { %v2387_v58 = vpop.permute.xlu0 %2386 }
 0x642   : > { %v2087_v51 = vpop.f32.mrf.mxu2 }
 0x646   : > { %3500 = vmatmul.msk.f32.vlgmr.msra.gmra.mxu3 %vm694_vm7, %v3495_v36 }
 0x647   : > { %v2037_v40 = vpop.permute.xlu1 %2036 }
 0x648   : > { %v2041_v41 = vsel %vm1114_vm13, %v2035_v28, %v2037_v40  ;;  %2145 = vmatpush.msra.mxu1 %v2037_v40  ;;  %v3520_v40 = vld [vmem:[%s4583_s4 + $0x10] sm:$0xff] }
 0x649   : > { %2125 = vmatpush.msra.mxu0 %v2041_v41  ;;  %3489 = vmatmul.msk.f32.vlgmr.msra.gmra.mxu1 %vm694_vm7, %v3484_v22 }
 0x64a   : > { %2228 = vmatpush.msrb.mxu1 %v1989_v17  ;;  %3488 = vmatmul.msk.f32.vlgmr.msra.gmra.mxu0 %vm694_vm7, %v3484_v22  ;;  %v2170_v54 = vpop.f32.mrf.mxu2 }
 0x64b   : > { %2208 = vmatpush.msrb.mxu0 %v1988_v15 }
 0x64f   : > { %v3745_v43 = vpop.permute.xlu1 %3744 }
 0x650   : > { %v3747_v44 = vunpack.i.h.bf16 %v3745_v43  ;;  %v3746_v45 = vunpack.i.l.bf16 %v3745_v43 }
 0x651   : > { %3493 = vmatmul.msk.f32.vlgmr.msrb.gmra.mxu1 %vm694_vm7, %v3483_v31 }
 0x652   : > { %3492 = vmatmul.msk.f32.vlgmr.msrb.gmra.mxu0 %vm694_vm7, %v3483_v31  ;;  %v2266_v46 = vsel %vm1342_vm14, %v3742_v34, %v3746_v45  ;;  %v2267_v12 = vsel %vm1342_vm14, %v3746_v45, %v3747_v44  ;;  %v2268_v48 = vsel %vm1342_vm14, %v3747_v44, %v2264_v39 }
 0x653   : > { %2312 = vmatpush.msra.mxu0 %v2266_v46  ;;  %2332 = vmatpush.msra.mxu1 %v2267_v12 }
 0x654   : > { %2352 = vmatpush.msra.mxu2 %v2268_v48 }
 0x655   : > { %3499 = vmatmul.msk.f32.vlgmr.msra.gmra.mxu2 %vm694_vm7, %v3495_v36 }
 0x659   : > { %3498 = vmatmul.msk.f32.vlgmr.msra.gmra.mxu1 %vm694_vm7, %v3495_v36 }
 0x65a   : > { %3497 = vmatmul.msk.f32.vlgmr.msra.gmra.mxu0 %vm694_vm7, %v3495_v36  ;;  %v2107_v49 = vpop.f32.mrf.mxu3  ;;  %v2250_v1 = vpop.f32.mrf.mxu2 }
 0x662   : > { %v2190_v52 = vpop.f32.mrf.mxu3 }
 0x663   : > { %v2191_v4 = vadd.f32 %v2190_v52, %v2087_v51 }
 0x69f   : > { %v2067_v53 = vpop.f32.mrf.mxu1 }
 0x6a0   : > { %v2171_v55 = vadd.f32 %v2170_v54, %v2067_v53 }
 0x6c1   : > { %v2294_v57 = vpop.f32.mrf.mxu3 }
 0x6c2   : > { %v2377_v59 = vadd.f32 %v2294_v57, %v2171_v55 }
 0x6c4   : > { %v2389_v60 = vadd.f32 %v2387_v58, %v2377_v59 }
 0x6c6   : > { %v2147_v61 = vpop.f32.mrf.mxu1  ;;  %2405 = vrot.lane.b32.xlu1 %v2389_v60, %s3885_s19 }
 0x6c7   : > { %v2127_v62 = vpop.f32.mrf.mxu0  ;;  %v2251_v16 = vadd.f32 %v2250_v1, %v2147_v61 }
 0x6c9   : > { %v2374_v18 = vpop.f32.mrf.mxu3 }
 0x6ca   : > { %v2381_v20 = vadd.f32 %v2374_v18, %v2251_v16 }
 0x6cc   : > { %v2393_v21 = vadd.f32 %v2387_v58, %v2381_v20 }
 0x6ce   : > { %v2230_v63 = vpop.f32.mrf.mxu1 }
 0x6cf   : > { %v2210_v0 = vpop.f32.mrf.mxu0  ;;  %v2231_v7 = vadd.f32 %v2230_v63, %v2127_v62 }
 0x6d0   : > { %v2211_v3 = vadd.f32 %v2210_v0, %v2107_v49 }
 0x6d6   : > { %v2334_v6 = vpop.f32.mrf.mxu1 }
 0x6d7   : > { %v2379_v8 = vadd.f32 %v2334_v6, %v2211_v3  ;;  %v2314_v9 = vpop.f32.mrf.mxu0 }
 0x6d8   : > { %v2378_v10 = vadd.f32 %v2314_v9, %v2191_v4  ;;  %v2354_v13 = vpop.f32.mrf.mxu2  ;;  %v3503_v4 = vld [vmem:[%s4582_s3 + $0x38] sm:$0xff] }
 0x6d9   : > { %v2391_v14 = vadd.f32 %v2387_v58, %v2379_v8  ;;  %v2380_v15 = vadd.f32 %v2354_v13, %v2231_v7 }
 0x6da   : > { %v2390_v17 = vadd.f32 %v2387_v58, %v2378_v10 }
 0x6db   : > { %v2392_v19 = vadd.f32 %v2387_v58, %v2380_v15  ;;  %2409 = vrot.lane.b32.xlu0 %v2391_v14, %s3885_s19 }
 0x6dc   : > { %2407 = vrot.lane.b32.xlu2 %v2390_v17, %s3885_s19 }
 0x6dd   : > { %2411 = vrot.lane.b32.xlu1 %v2392_v19, %s3885_s19 }
 0x6e4   : > { %2413 = vrot.lane.b32.xlu2 %v2393_v21, %s3885_s19  ;;  %v3502_v21 = vld [vmem:[%s4582_s3 + $0x30] sm:$0xff] }
 0x736   : > { %v2408_v22 = vpop.permute.xlu2 %2407 }
 0x738   : > { %v2406_v23 = vpop.permute.xlu1 %2405 }
 0x739   : > { %v2416_v24 = vsel %vm2415_vm15, %v2406_v23, %v2408_v22  ;;  %v2426_v25 = vadd.f32 %v2406_v23, %v4263_v47 }
 0x73a   : > { %v4380_v26 = vadd.f32 %v2416_v24, %v4220_v27 }
 0x73b   : > { %2433 = vst.msk [vmem:[#allocation2] sm:$0xff] %vm2432_vm2, %v2426_v25  ;;  %vm4601_vm2 = vcmask 1015768  }
 0x73c   : > { %2459 = vrot.lane.b32.xlu0 %v4380_v26, %s3885_s19  ;;  %2452 = vrot.lane.b32.xlu2 %v4380_v26, %s3887_s21  ;;  %vm2520_vm12 = vcmp.ge.f32.partialorder %v4380_v26, 0.0  ;;  %s4599_s19 = smov 8  }
 0x73d   : > { %2445 = vrot.lane.b32.xlu1 %v4380_v26, %s3884_s18 }
 0x73e   : > { %v2414_v28 = vpop.permute.xlu2 %2413 }
 0x73f   : > { %v2431_v38 = vadd.f32 %v2414_v28, %v4274_v56 }
 0x741   : > { %2439 = vst.msk [vmem:[#allocation2 + $0x28] sm:$0xff] %vm2438_vm11, %v2431_v38 }
 0x744   : > { %2473 = vrot.lane.b32.xlu2 %v4380_v26, %s3886_s20  ;;  %s3912_s20 = smov 1  }
 0x745   : > { %2466 = vrot.lane.b32.xlu1 %v4380_v26, %s4598_s16 }
 0x74d   : > { %v2410_v27 = vpop.permute.xlu0 %2409 }
 0x74e   : > { %v2417_v47 = vsel %vm2415_vm15, %v2408_v22, %v2410_v27 }
 0x74f   : > { %v4396_v50 = vadd.f32 %v2417_v47, %v4234_v2  ;;  %v2412_v29 = vpop.permute.xlu1 %2411  ;;  %v2526_v2 = vmul.f32 0.2, %v4380_v26 }
 0x750   : > { %v2418_v31 = vsel %vm2415_vm15, %v2410_v27, %v2412_v29  ;;  %v2419_v32 = vsel %vm2415_vm15, %v2412_v29, %v2414_v28  ;;  %vm4600_vm15 = vcmask 1023968   ;;  %v3514_v28 = vld [vmem:[%s4582_s3 + $0x40] sm:$0xff] }
 0x751   : > { %v4401_v56 = vadd.f32 %v2418_v31, %v4258_v42  ;;  %v4404_v5 = vadd.f32 %v2419_v32, %v4231_v30  ;;  %v2527_v11 = vmul.f32 0.2, %v4396_v50  ;;  %vm2521_vm3 = vcmp.ge.f32.partialorder %v4396_v50, 0.0 }
 0x752   : > { %v2532_v42 = vsel %vm2520_vm12, %v4380_v26, %v2526_v2 }
 0x753   : > { %2480 = vrot.lane.b32.xlu0 %v4404_v5, %s3893_s10  ;;  %2494 = vrot.lane.b32.xlu2 %v4404_v5, %s4597_s28  ;;  %v2533_v30 = vsel %vm2521_vm3, %v4396_v50, %v2527_v11  ;;  %v2529_v34 = vmul.f32 0.2, %v4404_v5  ;;  %vm2523_vm10 = vcmp.ge.f32.partialorder %v4404_v5, 0.0  ;;  %v2528_v37 = vmul.f32 0.2, %v4401_v56 }
 0x754   : > { %2487 = vrot.lane.b32.xlu1 %v4404_v5, %s3895_s14  ;;  %v3749_v33 = vpack.i.bf16 %v2533_v30, %v2532_v42  ;;  %vm2522_vm4 = vcmp.ge.f32.partialorder %v4401_v56, 0.0 }
 0x755   : > { %v2535_v35 = vsel %vm2523_vm10, %v4404_v5, %v2529_v34  ;;  %v2534_v39 = vsel %vm2522_vm4, %v4401_v56, %v2528_v37 }
 0x756   : > { %v3764_v36 = vpack.i.bf16 %v2535_v35, %v2533_v30 }
 0x75b   : > { %2501 = vrot.lane.b32.xlu0 %v4404_v5, %s4599_s19  ;;  %3750 = vrot.lane.b32.xlu2 %v3749_v33, %s3912_s20 }
 0x75c   : > { %2508 = vrot.lane.b32.xlu1 %v4404_v5, %s3900_s29  ;;  %s3423_s29 = sshll.u32 %s380_s8, 5 }
 0x763   : > { %3765 = vrot.lane.b32.xlu2 %v3764_v36, %s4597_s28 }
 0x76b   : > { %2679 = vrot.lane.b32.xlu2 %v2534_v39, %s4597_s28 }
 0x773   : > { %2929 = vperm.xlu2 %3732, %v3520_v40  }
 0x796   : > { %v2453_v41 = vpop.permute.xlu2 %2452 }
 0x79e   : > { %v2474_v43 = vpop.permute.xlu2 %2473 }
 0x7ad   : > { %v2495_v44 = vpop.permute.xlu2 %2494 }
 0x7ae   : > { %v2460_v46 = vpop.permute.xlu0 %2459 }
 0x7af   : > { %v2446_v45 = vpop.permute.xlu1 %2445 }
 0x7b0   : > { %2449 = vst.msk [vmem:[#allocation2] sm:$0xff] %vm475_vm6, %v2446_v45  ;;  %vm4602_vm6 = vcmask 31768  }
 0x7b1   : > { %2456 = vst.msk [vmem:[#allocation2] sm:$0xff] %vm482_vm8, %v2453_v41  ;;  %vm4603_vm8 = vcmask 39968  }
 0x7b2   : > { %2463 = vst.msk [vmem:[#allocation2] sm:$0xff] %vm489_vm9, %v2460_v46 }
 0x7b5   : > { %v3751_v12 = vpop.permute.xlu2 %3750 }
 0x7b6   : > { %v3753_v48 = vunpack.i.h.bf16 %v3751_v12  ;;  %v3752_v49 = vunpack.i.l.bf16 %v3751_v12 }
 0x7b7   : > { %v2467_v51 = vpop.permute.xlu1 %2466 }
 0x7b8   : > { %v2561_v52 = vsel %vm559_vm0, %v3752_v49, %v3753_v48  ;;  %2470 = vst.msk [vmem:[#allocation2] sm:$0xff] %vm4600_vm15, %v2467_v51 }
 0x7b9   : > { %2608 = vmatpush.msrb.mxu1 %v2561_v52  ;;  %2477 = vst.msk [vmem:[#allocation2] sm:$0xff] %vm4601_vm2, %v2474_v43 }
 0x7ba   : > { %3505 = vmatmul.msk.f32.vlgmr.msrb.gmra.mxu1 %vm694_vm7, %v3503_v4 }
 0x7bd   : > { %v3766_v6 = vpop.permute.xlu2 %3765 }
 0x7be   : > { %v3767_v7 = vunpack.i.l.bf16 %v3766_v6  ;;  %v3768_v20 = vunpack.i.h.bf16 %v3766_v6 }
 0x7c0   : > { %v2513_v53 = vld [vmem:[#allocation2] sm:$0xff] }
 0x7c1   : > { %vm2519_vm3 = vcmp.ge.f32.partialorder %v2513_v53, 0.0  ;;  %v2525_v54 = vmul.f32 0.2, %v2513_v53 }
 0x7c3   : > { %v2531_v55 = vsel %vm2519_vm3, %v2513_v53, %v2525_v54 }
 0x7c4   : > { %v3759_v57 = vpack.i.bf16 %v2532_v42, %v2531_v55  ;;  %v3754_v58 = vpack.i.bf16 %v2531_v55, %v2534_v39 }
 0x7c5   : > { %v2481_v59 = vpop.permute.xlu0 %2480  ;;  %v2680_v29 = vpop.permute.xlu2 %2679 }
 0x7c6   : > { %2484 = vst.msk [vmem:[#allocation2 + $0x28] sm:$0xff] %vm559_vm0, %v2481_v59  ;;  %v2488_v60 = vpop.permute.xlu1 %2487  ;;  %3760 = vrot.lane.b32.xlu1 %v3759_v57, %s4597_s28  ;;  %3755 = vrot.lane.b32.xlu0 %v3754_v58, %s3912_s20  ;;  %v2685_v2 = vsel %vm2438_vm11, %v3767_v7, %v2680_v29  ;;  %v2686_v30 = vsel %vm2438_vm11, %v2680_v29, %v3768_v20  ;;  %s382_s28 = scalar_lea.vmem [#allocation4], %s3423_s29 }
 0x7c7   : > { %2491 = vst.msk [vmem:[#allocation2 + $0x28] sm:$0xff] %vm566_vm1, %v2488_v60 }
 0x7c8   : > { %2498 = vst.msk [vmem:[#allocation2 + $0x28] sm:$0xff] %vm573_vm5, %v2495_v44  ;;  %vm2807_vm5 = vcmask 1014784  }
 0x7cd   : > { %v2502_v61 = vpop.permute.xlu0 %2501  ;;  %v2930_v51 = vpop.permute.xlu2 %2929 }
 0x7ce   : > { %2505 = vst.msk [vmem:[#allocation2 + $0x28] sm:$0xff] %vm4602_vm6, %v2502_v61  ;;  %v2509_v62 = vpop.permute.xlu1 %2508  ;;  %3775 = vrot.lane.b32.xlu1 %v3749_v33, %s3887_s21 }
 0x7cf   : > { %2512 = vst.msk [vmem:[#allocation2 + $0x28] sm:$0xff] %vm4603_vm8, %v2509_v62 }
 0x7d6   : > { %v2518_v63 = vld [vmem:[#allocation2 + $0x28] sm:$0xff]  ;;  %2801 = vrot.lane.b32.xlu1 %v2534_v39, %s3887_s21 }
 0x7d7   : > { %vm2524_vm9 = vcmp.ge.f32.partialorder %v2518_v63, 0.0  ;;  %v2530_v0 = vmul.f32 0.2, %v2518_v63 }
 0x7d9   : > { %v2536_v1 = vsel %vm2524_vm9, %v2518_v63, %v2530_v0 }
 0x7da   : > { %v3769_v3 = vpack.i.bf16 %v2536_v1, %v2535_v35 }
 0x7dc   : > { %3770 = vrot.lane.b32.xlu0 %v3769_v3, %s3912_s20  ;;  %s3824_s20 = scalar_lea.hbm %s4586_s7, 64 }
 0x7e4   : > { %3780 = vrot.lane.b32.xlu0 %v3769_v3, %s3887_s21  ;;  %s3546_s21 = sshll.u32 %s3874_s25, 5  ;;  %s3288_s25 = scalar_lea.sflag [#allocation5], %s380_s8 }
 0x7e5   : > { %s3301_s23 = scalar_lea.hbm %s4586_s7, %s3546_s21 }
 0x7e6   : > { %s3305_s17 = sshll.u32 %s3301_s23, 4  ;;  %s3306_s17 = int_to_ptr.hbm [resolvable:$true] %s3305_s17 }
 0x7e7   : > { %s3818_s16 = sshra.s32 %s3306_s17, 4  ;;  %s3819_s16 = int_to_ptr.hbm [resolvable:$true] %s3818_s16 }
 0x7e8   : > { %s3820_s19 = scalar_lea.hbm %s3819_s16, 32  ;;  %p3825_p1 = scmp.lt.s32.totalorder %s3819_s16, %s4586_s7 }
 0x7e9   : > { %p3821_p12 = scmp.ne.s32.totalorder %s3819_s16, %s3820_s19  ;;  %p3826_p2 = scmp.lt.s32.totalorder %s3824_s20, %s3820_s19 }
 0x7eb   : > { %p3822_p13 = pnand %p3821_p12, %p3993_p4  ;;  %p3827_p3 = por %p3826_p2, %p3825_p1 }
 0x7ed   : > { %p3823_p0 = pneg %p3822_p13 }
 0x7ef   : > { %p3828_p5 = pnand %p3827_p3, %p3823_p0 }
 0x837   : > { %v2610_v39 = vpop.f32.mrf.mxu1 }
 0x838   : > { %v3761_v8 = vpop.permute.xlu1 %3760  ;;  %v3756_v9 = vpop.permute.xlu0 %3755 }
 0x839   : > { %v3763_v10 = vunpack.i.h.bf16 %v3761_v8  ;;  %v3762_v13 = vunpack.i.l.bf16 %v3761_v8  ;;  %v3758_v14 = vunpack.i.h.bf16 %v3756_v9  ;;  %v3757_v15 = vunpack.i.l.bf16 %v3756_v9 }
 0x83b   : > { %v2560_v16 = vsel %vm559_vm0, %v3758_v14, %v3752_v49  ;;  %v2562_v17 = vsel %vm559_vm0, %v3753_v48, %v3757_v15  ;;  %v2683_v18 = vsel %vm2438_vm11, %v3762_v13, %v3763_v10  ;;  %v2684_v19 = vsel %vm2438_vm11, %v3763_v10, %v3767_v7 }
 0x83c   : > { %2588 = vmatpush.msrb.mxu0 %v2560_v16  ;;  %2628 = vmatpush.msrb.mxu2 %v2562_v17  ;;  %vm2941_vm11 = vcmask 15360  }
 0x83d   : > { %2710 = vmatpush.msra.mxu1 %v2683_v18  ;;  %3506 = vmatmul.msk.f32.vlgmr.msrb.gmra.mxu2 %vm694_vm7, %v3503_v4 }
 0x83e   : > { %2730 = vmatpush.msra.mxu2 %v2684_v19  ;;  %3504 = vmatmul.msk.f32.vlgmr.msrb.gmra.mxu0 %vm694_vm7, %v3503_v4  ;;  %v3536_v19 = vld [vmem:[%s4585_s6 + $0x10] sm:$0xff] }
 0x83f   : > { %2790 = vmatpush.msrb.mxu1 %v3768_v20 }
 0x840   : > { %3509 = vmatmul.msk.f32.vlgmr.msra.gmra.mxu1 %vm694_vm7, %v3502_v21  ;;  %v3776_v22 = vpop.permute.xlu1 %3775 }
 0x841   : > { %v3778_v23 = vunpack.i.h.bf16 %v3776_v22  ;;  %v3777_v24 = vunpack.i.l.bf16 %v3776_v22 }
 0x843   : > { %v2808_v25 = vsel %vm2807_vm5, %v3777_v24, %v3778_v23  ;;  %v3522_v24 = vld [vmem:[%s4584_s5 + $0x38] sm:$0xff] }
 0x844   : > { %2835 = vmatpush.msrb.mxu2 %v2808_v25 }
 0x845   : > { %3510 = vmatmul.msk.f32.vlgmr.msra.gmra.mxu2 %vm694_vm7, %v3502_v21 }
 0x848   : > { %3513 = vmatmul.msk.f32.vlgmr.msrb.gmra.mxu1 %vm694_vm7, %v3502_v21  ;;  %v2802_v31 = vpop.permute.xlu1 %2801 }
 0x849   : > { %v2809_v42 = vsel %vm2807_vm5, %v3778_v23, %v2802_v31 }
 0x84d   : > { %3515 = vmatmul.msk.f32.vlgmr.msrb.gmra.mxu2 %vm694_vm7, %v3514_v28 }
 0x84e   : > { %v3771_v38 = vpop.permute.xlu0 %3770 }
 0x84f   : > { %v3773_v27 = vunpack.i.h.bf16 %v3771_v38  ;;  %v3772_v47 = vunpack.i.l.bf16 %v3771_v38 }
 0x851   : > { %v2563_v32 = vsel %vm559_vm0, %v3757_v15, %v3772_v47  ;;  %v2564_v11 = vsel %vm559_vm0, %v3772_v47, %v3773_v27 }
 0x852   : > { %2648 = vmatpush.msrb.mxu3 %v2563_v32  ;;  %2668 = vmatpush.msra.mxu0 %v2564_v11 }
 0x853   : > { %3507 = vmatmul.msk.f32.vlgmr.msrb.gmra.mxu3 %vm694_vm7, %v3503_v4  ;;  %3508 = vmatmul.msk.f32.vlgmr.msra.gmra.mxu0 %vm694_vm7, %v3503_v4 }
 0x854   : > { %2750 = vmatpush.msra.mxu3 %v2685_v2  ;;  %2770 = vmatpush.msrb.mxu0 %v2686_v30  ;;  %v3531_v2 = vld [vmem:[%s4584_s5 + $0x40] sm:$0xff] }
 0x856   : > { %2855 = vmatpush.msrb.mxu3 %v2809_v42  ;;  %v3781_v33 = vpop.permute.xlu0 %3780 }
 0x857   : > { %v3783_v34 = vunpack.i.h.bf16 %v3781_v33  ;;  %v3782_v35 = vunpack.i.l.bf16 %v3781_v33 }
 0x859   : > { %2915 = vmatpush.msra.mxu2 %v3783_v34  ;;  %v2810_v36 = vsel %vm2807_vm5, %v2802_v31, %v3782_v35  ;;  %v2811_v37 = vsel %vm2807_vm5, %v3782_v35, %v3783_v34  ;;  %v3521_v31 = vld [vmem:[%s4584_s5 + $0x30] sm:$0xff] }
 0x85a   : > { %2875 = vmatpush.msra.mxu0 %v2810_v36  ;;  %2895 = vmatpush.msra.mxu1 %v2811_v37 }
 0x85b   : > { %3511 = vmatmul.msk.f32.vlgmr.msra.gmra.mxu3 %vm694_vm7, %v3502_v21  ;;  %3512 = vmatmul.msk.f32.vlgmr.msrb.gmra.mxu0 %vm694_vm7, %v3502_v21 }
 0x85c   : > { %3519 = vmatmul.msk.f32.vlgmr.msra.gmra.mxu2 %vm694_vm7, %v3514_v28  ;;  %3518 = vmatmul.msk.f32.vlgmr.msra.gmra.mxu1 %vm694_vm7, %v3514_v28 }
 0x863   : > { %3516 = vmatmul.msk.f32.vlgmr.msrb.gmra.mxu3 %vm694_vm7, %v3514_v28  ;;  %3517 = vmatmul.msk.f32.vlgmr.msra.gmra.mxu0 %vm694_vm7, %v3514_v28 }
 0x8bb   : > { %v2590_v41 = vpop.f32.mrf.mxu0 }
 0x8bd   : > { %v2712_v43 = vpop.f32.mrf.mxu1 }
 0x8be   : > { %v2713_v45 = vadd.f32 %v2712_v43, %v2590_v41 }
 0x8c0   : > { %v2630_v40 = vpop.f32.mrf.mxu2 }
 0x8c5   : > { %v2792_v48 = vpop.f32.mrf.mxu1 }
 0x8c8   : > { %v2732_v44 = vpop.f32.mrf.mxu2 }
 0x8c9   : > { %v2733_v7 = vadd.f32 %v2732_v44, %v2610_v39 }
 0x8d0   : > { %v2670_v46 = vpop.f32.mrf.mxu0  ;;  %v2837_v12 = vpop.f32.mrf.mxu2 }
 0x8d1   : > { %v2920_v49 = vadd.f32 %v2837_v12, %v2713_v45  ;;  %v2793_v60 = vadd.f32 %v2792_v48, %v2670_v46 }
 0x8d3   : > { %v2932_v52 = vadd.f32 %v2930_v51, %v2920_v49 }
 0x8d5   : > { %2937 = vst [vmem:[#allocation3] sm:$0xff] %v2932_v52  ;;  %2948 = vrot.lane.b32.xlu0 %v2932_v52, %s3884_s18 }
 0x8d6   : > { %v2650_v53 = vpop.f32.mrf.mxu3 }
 0x8d8   : > { %v2772_v54 = vpop.f32.mrf.mxu0 }
 0x8d9   : > { %v2773_v55 = vadd.f32 %v2772_v54, %v2650_v53  ;;  %v2897_v57 = vpop.f32.mrf.mxu1 }
 0x8db   : > { %v2923_v58 = vadd.f32 %v2897_v57, %v2773_v55 }
 0x8dd   : > { %v4488_v59 = vadd.f32 %v2930_v51, %v2923_v58 }
 0x8de   : > { %v2752_v61 = vpop.f32.mrf.mxu3 }
 0x8df   : > { %v2753_v62 = vadd.f32 %v2752_v61, %v2630_v40  ;;  %v2917_v63 = vpop.f32.mrf.mxu2  ;;  %2954 = vrot.lane.b32.xlu1 %v4488_v59, %s3893_s10  ;;  %s3303_s10 = sshll.u32 %s382_s28, 4  ;;  %s3304_s10 = int_to_ptr.vmem [resolvable:$true] %s3303_s10 }
 0x8e0   : > { %v2924_v0 = vadd.f32 %v2917_v63, %v2793_v60  ;;  %v2877_v1 = vpop.f32.mrf.mxu0 }
 0x8e1   : > { %v2922_v3 = vadd.f32 %v2877_v1, %v2753_v62 }
 0x8e2   : > { %v2936_v4 = vadd.f32 %v2930_v51, %v2924_v0 }
 0x8e3   : > { %v2934_v6 = vadd.f32 %v2930_v51, %v2922_v3 }
 0x8e4   : > { %2942 = vst.msk [vmem:[#allocation3 + $0x20] sm:$0xff] %vm2941_vm11, %v2936_v4 }
 0x8e6   : > { %v2857_v8 = vpop.f32.mrf.mxu3 }
 0x8e7   : > { %v2921_v9 = vadd.f32 %v2857_v8, %v2733_v7  ;;  %2977 = vrot.lane.b32.xlu1 %v2934_v6, %s3910_s22 }
 0x8e9   : > { %v2933_v10 = vadd.f32 %v2930_v51, %v2921_v9 }
 0x8ef   : > { %3163 = vrot.lane.b32.xlu1 %v2934_v6, %s3884_s18 }
 0x947   : > { %v2949_v13 = vpop.permute.xlu0 %2948 }
 0x948   : > { %2951 = vst.msk [vmem:[#allocation3] sm:$0xff] %vm559_vm0, %v2949_v13 }
 0x94f   : > { %v2961_v14 = vld [vmem:[#allocation3] sm:$0xff] }
 0x950   : > { %v3784_v15 = vpack.i.bf16 %v2933_v10, %v2961_v14 }
 0x951   : > { %v2955_v16 = vpop.permute.xlu1 %2954 }
 0x952   : > { %2958 = vst.msk [vmem:[#allocation3 + $0x20] sm:$0xff] %vm566_vm1, %v2955_v16  ;;  %3785 = vrot.lane.b32.xlu2 %v3784_v15, %s3910_s22 }
 0x959   : > { %v2967_v17 = vld [vmem:[#allocation3 + $0x20] sm:$0xff]  ;;  %v2978_v20 = vpop.permute.xlu1 %2977 }
 0x95a   : > { %v3789_v18 = vpack.i.bf16 %v2967_v17, %v4488_v59  ;;  %3795 = vrot.lane.b32.xlu2 %v3784_v15, %s3884_s18 }
 0x95c   : > { %3790 = vrot.lane.b32.xlu0 %v3789_v18, %s3910_s22 }
 0x961   : > { %v3164_v29 = vpop.permute.xlu1 %3163 }
 0x962   : > { %3268 = vperm.xlu2 %3732, %v3536_v19  }
 0x964   : > { %3800 = vrot.lane.b32.xlu0 %v3789_v18, %s3884_s18 }
 0x9ac   : > { %v3786_v21 = vpop.permute.xlu2 %3785 }
 0x9ad   : > { %v3788_v22 = vunpack.i.h.bf16 %v3786_v21  ;;  %v3787_v23 = vunpack.i.l.bf16 %v3786_v21 }
 0x9af   : > { %v2983_v25 = vsel %vm1114_vm13, %v3787_v23, %v3788_v22  ;;  %v2984_v28 = vsel %vm1114_vm13, %v3788_v22, %v2978_v20 }
 0x9b0   : > { %3009 = vmatpush.msra.mxu3 %v2983_v25  ;;  %3029 = vmatpush.msrb.mxu0 %v2984_v28 }
 0x9b1   : > { %3523 = vmatmul.msk.f32.vlgmr.msra.gmra.mxu3 %vm694_vm7, %v3522_v24  ;;  %3524 = vmatmul.msk.f32.vlgmr.msrb.gmra.mxu0 %vm694_vm7, %v3522_v24 }
 0x9b2   : > { %3092 = vmatpush.msrb.mxu3 %v2961_v14  ;;  %3112 = vmatpush.msra.mxu0 %v2933_v10 }
 0x9b4   : > { %v3796_v38 = vpop.permute.xlu2 %3795 }
 0x9b5   : > { %v3798_v27 = vunpack.i.h.bf16 %v3796_v38  ;;  %v3797_v47 = vunpack.i.l.bf16 %v3796_v38 }
 0x9b7   : > { %v3169_v32 = vsel %vm1342_vm14, %v3797_v47, %v3798_v27  ;;  %v3170_v11 = vsel %vm1342_vm14, %v3798_v27, %v3164_v29 }
 0x9b8   : > { %3195 = vmatpush.msra.mxu3 %v3169_v32  ;;  %3215 = vmatpush.msrb.mxu0 %v3170_v11 }
 0x9b9   : > { %3527 = vmatmul.msk.f32.vlgmr.msrb.gmra.mxu3 %vm694_vm7, %v3521_v31  ;;  %3528 = vmatmul.msk.f32.vlgmr.msra.gmra.mxu0 %vm694_vm7, %v3521_v31 }
 0x9bc   : > { %v3269_v51 = vpop.permute.xlu2 %3268 }
 0x9c1   : > { %3532 = vmatmul.msk.f32.vlgmr.msra.gmra.mxu3 %vm694_vm7, %v3531_v2  ;;  %3533 = vmatmul.msk.f32.vlgmr.msrb.gmra.mxu0 %vm694_vm7, %v3531_v2 }
 0x9ce   : > { %v3791_v30 = vpop.permute.xlu0 %3790 }
 0x9cf   : > { %v3793_v42 = vunpack.i.h.bf16 %v3791_v30  ;;  %v3792_v33 = vunpack.i.l.bf16 %v3791_v30 }
 0x9d1   : > { %v2985_v34 = vsel %vm1114_vm13, %v2978_v20, %v3792_v33  ;;  %v2986_v35 = vsel %vm1114_vm13, %v3792_v33, %v3793_v42 }
 0x9d2   : > { %3049 = vmatpush.msrb.mxu1 %v2985_v34  ;;  %3069 = vmatpush.msrb.mxu2 %v2986_v35 }
 0x9d3   : > { %3525 = vmatmul.msk.f32.vlgmr.msrb.gmra.mxu1 %vm694_vm7, %v3522_v24  ;;  %3526 = vmatmul.msk.f32.vlgmr.msrb.gmra.mxu2 %vm694_vm7, %v3522_v24 }
 0x9d4   : > { %3132 = vmatpush.msra.mxu1 %v2934_v6  ;;  %3152 = vmatpush.msra.mxu2 %v4488_v59 }
 0x9d6   : > { %v3801_v36 = vpop.permute.xlu0 %3800 }
 0x9d7   : > { %v3803_v37 = vunpack.i.h.bf16 %v3801_v36  ;;  %v3802_v39 = vunpack.i.l.bf16 %v3801_v36 }
 0x9d9   : > { %v3171_v40 = vsel %vm1342_vm14, %v3164_v29, %v3802_v39  ;;  %v3172_v41 = vsel %vm1342_vm14, %v3802_v39, %v3803_v37 }
 0x9da   : > { %3235 = vmatpush.msrb.mxu1 %v3171_v40  ;;  %3255 = vmatpush.msrb.mxu2 %v3172_v41 }
 0x9db   : > { %3529 = vmatmul.msk.f32.vlgmr.msra.gmra.mxu1 %vm694_vm7, %v3521_v31  ;;  %3530 = vmatmul.msk.f32.vlgmr.msra.gmra.mxu2 %vm694_vm7, %v3521_v31 }
 0x9e3   : > { %3534 = vmatmul.msk.f32.vlgmr.msrb.gmra.mxu1 %vm694_vm7, %v3531_v2  ;;  %3535 = vmatmul.msk.f32.vlgmr.msrb.gmra.mxu2 %vm694_vm7, %v3531_v2 }
 0xa2e   : > { %v3031_v43 = vpop.f32.mrf.mxu0 }
 0xa34   : > { %v3011_v44 = vpop.f32.mrf.mxu3 }
 0xa36   : > { %v3114_v45 = vpop.f32.mrf.mxu0 }
 0xa37   : > { %v3115_v46 = vadd.f32 %v3114_v45, %v3031_v43 }
 0xa3c   : > { %v3094_v12 = vpop.f32.mrf.mxu3 }
 0xa3d   : > { %v3095_v52 = vadd.f32 %v3094_v12, %v3011_v44 }
 0xa3e   : > { %v3217_v48 = vpop.f32.mrf.mxu0 }
 0xa3f   : > { %v3261_v49 = vadd.f32 %v3217_v48, %v3115_v46 }
 0xa41   : > { %v3272_v53 = vadd.f32 %v3269_v51, %v3261_v49 }
 0xa43   : > { %v3280_v54 = vadd.f32 %v3272_v53, %v4396_v50 }
 0xa44   : > { %v3197_v55 = vpop.f32.mrf.mxu3 }
 0xa45   : > { %3284 = vst [vmem:[%s382_s28 + $0x8] sm:$0xff] %v3280_v54  ;;  %v3260_v57 = vadd.f32 %v3197_v55, %v3095_v52 }
 0xa47   : > { %v3271_v58 = vadd.f32 %v3269_v51, %v3260_v57 }
 0xa49   : > { %v3279_v59 = vadd.f32 %v3271_v58, %v4380_v26 }
 0xa4b   : > { %3283 = vst [vmem:[%s382_s28] sm:$0xff] %v3279_v59 }
 0xa50   : > { %v3051_v60 = vpop.f32.mrf.mxu1 }
 0xa56   : > { %v3071_v61 = vpop.f32.mrf.mxu2 }
 0xa58   : > { %v3134_v62 = vpop.f32.mrf.mxu1 }
 0xa59   : > { %v3135_v0 = vadd.f32 %v3134_v62, %v3051_v60 }
 0xa5e   : > { %v3154_v63 = vpop.f32.mrf.mxu2 }
 0xa5f   : > { %v3155_v6 = vadd.f32 %v3154_v63, %v3071_v61 }
 0xa60   : > { %v3237_v1 = vpop.f32.mrf.mxu1 }
 0xa61   : > { %v3262_v3 = vadd.f32 %v3237_v1, %v3135_v0 }
 0xa63   : > { %v3273_v4 = vadd.f32 %v3269_v51, %v3262_v3 }
 0xa65   : > { %v3281_v50 = vadd.f32 %v3273_v4, %v4401_v56 }
 0xa66   : > { %v3257_v26 = vpop.f32.mrf.mxu2 }
 0xa67   : > { %3285 = vst [vmem:[%s382_s28 + $0x10] sm:$0xff] %v3281_v50  ;;  %v3263_v7 = vadd.f32 %v3257_v26, %v3155_v6 }
 0xa69   : > { %v3274_v8 = vadd.f32 %v3269_v51, %v3263_v7 }
 0xa6b   : > { %v3282_v9 = vadd.f32 %v3274_v8, %v4404_v5 }
 0xa6d   : > { %3286 = vst [vmem:[%s382_s28 + $0x18] sm:$0xff] %v3282_v9 }
 0xa6e   : > { %3831 = shalt.err (!%p3828_p5)
}
 0xa6f   : > { %3547 = dma.vmem_to_hbm [thread:$0]  (%p3993_p4), %s3304_s10, 512, %s3306_s17, %s3288_s25  }
 0xa70 PF: > { %p3553_p6 = scmp.ge.s32.totalorder %s3882_s27, 2  ;;  %s3317_s8 = sand.u32 1, %s3862_s1  }
 0xa71   : > { %s3318_s28 = scalar_lea.sflag [#allocation5], %s3317_s8 }
 0xa72   : > { %p3550_p7 = pnand %p3553_p6, %p4000_p8 }
 0xa74   : > { %p3551_p9 = pneg %p3550_p7 }
 0xa76   : > { %3857 = dma.done.wait (%p3551_p9), %s3318_s28, 512  }
 0xa77   : > { %3859 = vsyncadd (%p3551_p9), %s3318_s28, 4294966784  ;;  %s20_s27 = sadd.s32 1, %s3882_s27   ;;  %s4604_s1 = smov %s3866_s2 }
 0xa78   : > { %p17_p10 = scmp.ge.s32.totalorder %s20_s27, 4   ;;  %s4605_s2 = smov %s3870_s24 }
 0xa79   : > { %s4606_s24 = smov %s4006_s12  ;;  %s4607_s25 = smov %s3878_s26 }
 0xa7a   : > { %s4608_s26 = smov %s4610_s30  ;;  %19 = sbr.rel (!%p17_p10) target bundleno = 4 (0x4), region = 141 }
 0xa7f   :  { %3324 = vsyncpa [#allocation5], 1 }
 0xa80   :  { %3326 = vsyncpa [#allocation5 + $0x1], 1 }

</bundles_post_ra>
